<compile_context>
chip_gen: v6e
topology: v6e:2x2x1
jax: 0.10.0
libtpu: 0.0.40
codegen_flags: <defaults>
</compile_context>

<pallas_src>
import functools

import jax
import jax.numpy as jnp
from jax.experimental import pallas as pl
from jax.experimental.pallas import tpu as pltpu

SuperNetSetting = [
    [4, 8, 12, 16], [4, 8, 12, 16], [4, 8, 12, 16], [4, 8, 12, 16],
    [4, 8, 12, 16], [4, 8, 12, 16], [4, 8, 12, 16],
    [4, 8, 12, 16, 20, 24, 28, 32], [4, 8, 12, 16, 20, 24, 28, 32],
    [4, 8, 12, 16, 20, 24, 28, 32], [4, 8, 12, 16, 20, 24, 28, 32],
    [4, 8, 12, 16, 20, 24, 28, 32], [4, 8, 12, 16, 20, 24, 28, 32],
    [4, 8, 12, 16, 20, 24, 28, 32, 36, 40, 44, 48, 52, 56, 60, 64],
    [4, 8, 12, 16, 20, 24, 28, 32, 36, 40, 44, 48, 52, 56, 60, 64],
    [4, 8, 12, 16, 20, 24, 28, 32, 36, 40, 44, 48, 52, 56, 60, 64],
    [4, 8, 12, 16, 20, 24, 28, 32, 36, 40, 44, 48, 52, 56, 60, 64],
    [4, 8, 12, 16, 20, 24, 28, 32, 36, 40, 44, 48, 52, 56, 60, 64],
    [4, 8, 12, 16, 20, 24, 28, 32, 36, 40, 44, 48, 52, 56, 60, 64],
    [4, 8, 12, 16, 20, 24, 28, 32, 36, 40, 44, 48, 52, 56, 60, 64],
]

BN_EPS = 1e-5
VMEM_LIMIT = 32 * 1024 * 1024  # explicit; > v5e default (16 MiB), safe on v7x


def get_same_padding(kernel_size):
    assert isinstance(kernel_size, int)
    assert kernel_size % 2 > 0, "kernel size should be odd number"
    return kernel_size // 2


# --------------------------- Pallas kernels ----------------------------------
def _conv_tile(x_ref, w_ref, m_ref, *, k, W, HW, C_out):
    """K*K shifted-slice conv for one batch image (stride 1, same padding).

    x_ref : (C_in, L) bf16 — rows zero-padded, flattened, plus `pad` guard
            lanes at each end so every shift is a static in-bounds slice.
    w_ref : (k*k, C_out, C_in) bf16 — one MXU lhs slab per (ki, kj) tap.
    m_ref : (k, HW) bf16 — per-kj column-validity masks ("same" padding in W).
    Returns the (C_out, HW) float32 conv output tile.
    """
    x = x_ref[...]                                     # (C_in, L)
    p = k // 2
    acc = jnp.zeros((C_out, HW), jnp.float32)
    for ki in range(k):
        for kj in range(k):
            start = ki * W + kj                        # static shift: p_idx + ki*W + kj - p
            xs = x[:, start:start + HW] * m_ref[kj:kj + 1, :]   # (C_in, HW) bf16
            acc = acc + jnp.dot(w_ref[ki * k + kj], xs,
                                preferred_element_type=jnp.float32)
    del p
    return acc


def _stats_kernel(x_ref, w_ref, m_ref, sum_ref, sq_ref, *, k, W, HW, C_out):
    """Pass 1: per-batch channel sum / sum-of-squares of the conv output."""
    y = _conv_tile(x_ref, w_ref, m_ref, k=k, W=W, HW=HW, C_out=C_out)
    sum_ref[...] = jnp.sum(y, axis=1, keepdims=True)
    sq_ref[...] = jnp.sum(y * y, axis=1, keepdims=True)


def _apply_kernel(x_ref, w_ref, m_ref, scale_ref, bias_ref, o_ref,
                  *, k, W, HW, C_out):
    """Pass 2: recompute the conv tile and apply folded BN + channel mask."""
    y = _conv_tile(x_ref, w_ref, m_ref, k=k, W=W, HW=HW, C_out=C_out)
    o_ref[...] = y * scale_ref[...] + bias_ref[...]


# ------------------------------ wrapper ---------------------------------------
def masked_conv2d_bn(x, weight, gamma, beta, mask, *, kernel_size, stride):
    """x: (N, C_in, H, W) f32 NCHW. Returns (N, C_out, Ho, Wo) f32."""
    N, C_in, H, W = x.shape
    C_out = weight.shape[0]
    k = kernel_size
    p = get_same_padding(k)

    # TODO(synk): support stride > 1 (downsample layers) via a strided output
    # gather or an im2col fallback; the stride-1 path covers this module config.
    assert stride == 1, "Pallas path currently implements stride == 1 only"
    Ho, Wo = H, W
    HW = Ho * Wo
    Hp = H + 2 * p
    L = HW + 2 * p * W + 2 * p          # rows padded, flattened, + lane guards

    # Row-padded, flattened, guard-padded input (bf16 MXU operand). Only the
    # small zero padding is added in HBM — no K*K im2col expansion.
    xp = jnp.pad(x, ((0, 0), (0, 0), (p, p), (0, 0)))          # (N, C, Hp, W)
    xg = jnp.pad(xp.reshape(N, C_in, Hp * W), ((0, 0), (0, 0), (p, p)))
    xg = xg.astype(jnp.bfloat16)                               # (N, C, L)

    # Weight as (k*k, C_out, C_in): one 2-D lhs slab per kernel tap.
    w_r = jnp.transpose(weight.reshape(C_out, C_in, k * k),
                        (2, 0, 1)).astype(jnp.bfloat16)

    # Per-kj column-validity masks: output col w contributes iff 0 <= w+kj-p < W.
    col = jnp.arange(HW, dtype=jnp.int32) % W
    kj_idx = jnp.arange(k, dtype=jnp.int32)[:, None]
    col_mask = ((col[None, :] + kj_idx - p >= 0)
                & (col[None, :] + kj_idx - p < W)).astype(jnp.bfloat16)  # (k, HW)

    flops_conv = 2 * N * C_out * C_in * k * k * HW

    # ---- pass 1: per-batch stats (batch axis fully parallel -> v7x megacore) ----
    kern1 = functools.partial(_stats_kernel, k=k, W=W, HW=HW, C_out=C_out)
    cost1 = pl.CostEstimate(
        flops=flops_conv, transcendentals=0,
        bytes_accessed=(xg.size * 2 + w_r.size * 2 + col_mask.size * 2
                        + 2 * N * C_out * 4))
    s_part, sq_part = pl.pallas_call(
        kern1,
        out_shape=(jax.ShapeDtypeStruct((N, C_out, 1), jnp.float32),
                   jax.ShapeDtypeStruct((N, C_out, 1), jnp.float32)),
        grid=(N,),
        in_specs=[
            pl.BlockSpec((None, C_in, L), lambda n: (n, 0, 0)),
            pl.BlockSpec((k * k, C_out, C_in), lambda n: (0, 0, 0)),
            pl.BlockSpec((k, HW), lambda n: (0, 0)),
        ],
        out_specs=(
            pl.BlockSpec((None, C_out, 1), lambda n: (n, 0, 0)),
            pl.BlockSpec((None, C_out, 1), lambda n: (n, 0, 0)),
        ),
        compiler_params=pltpu.CompilerParams(
            dimension_semantics=("parallel",),
            vmem_limit_bytes=VMEM_LIMIT),
        cost_estimate=cost1,
    )(xg, w_r, col_mask)

    # Combine per-batch partials on host (tiny vectors); fold BN + channel mask
    # into a single per-channel scale/bias (all f32, biased variance, eps=1e-5).
    count = jnp.float32(N * HW)
    total_s = jnp.sum(s_part[:, :, 0], axis=0)
    total_sq = jnp.sum(sq_part[:, :, 0], axis=0)
    mean = total_s / count
    var = jnp.maximum(total_sq / count - mean * mean, 0.0)
    inv_std = jax.lax.rsqrt(var + BN_EPS)
    g = gamma.astype(jnp.float32)
    b = beta.astype(jnp.float32)
    m = mask.astype(jnp.float32)
    scale = (g * m * inv_std).reshape(C_out, 1)
    bias = ((b - mean * g * inv_std) * m).reshape(C_out, 1)

    # ---- pass 2: recompute conv tile, apply scale/bias, single output store ----
    kern2 = functools.partial(_apply_kernel, k=k, W=W, HW=HW, C_out=C_out)
    cost2 = pl.CostEstimate(
        flops=flops_conv + 2 * N * C_out * HW, transcendentals=0,
        bytes_accessed=(xg.size * 2 + w_r.size * 2 + col_mask.size * 2
                        + 2 * C_out * 4 + N * C_out * HW * 4))
    out = pl.pallas_call(
        kern2,
        out_shape=jax.ShapeDtypeStruct((N, C_out, HW), jnp.float32),
        grid=(N,),
        in_specs=[
            pl.BlockSpec((None, C_in, L), lambda n: (n, 0, 0)),
            pl.BlockSpec((k * k, C_out, C_in), lambda n: (0, 0, 0)),
            pl.BlockSpec((k, HW), lambda n: (0, 0)),
            pl.BlockSpec((C_out, 1), lambda n: (0, 0)),
            pl.BlockSpec((C_out, 1), lambda n: (0, 0)),
        ],
        out_specs=pl.BlockSpec((None, C_out, HW), lambda n: (n, 0, 0)),
        compiler_params=pltpu.CompilerParams(
            dimension_semantics=("parallel",),
            vmem_limit_bytes=VMEM_LIMIT),
        cost_estimate=cost2,
    )(xg, w_r, col_mask, scale, bias)

    # Output already in NCHW channel-major order; reshape is free.
    return out.reshape(N, C_out, Ho, Wo)


# ------------------------------ reference ------------------------------------
def _reference(x, weight, gamma, beta, mask, *, kernel_size, stride):
    # Matches the kernel's precision choice: bf16 conv operands, f32 math.
    pad = get_same_padding(kernel_size)
    xb = x.astype(jnp.bfloat16).astype(jnp.float32)
    wb = weight.astype(jnp.bfloat16).astype(jnp.float32)
    y = jax.lax.conv_general_dilated(
        xb, wb, window_strides=(stride, stride),
        padding=((pad, pad), (pad, pad)),
        dimension_numbers=("NCHW", "OIHW", "NCHW"),
        precision=jax.lax.Precision.HIGHEST)
    m = jnp.mean(y, axis=(0, 2, 3), keepdims=True)
    v = jnp.mean((y - m) ** 2, axis=(0, 2, 3), keepdims=True)   # biased variance
    yn = (y - m) * jax.lax.rsqrt(v + BN_EPS)
    out = yn * gamma[None, :, None, None] + beta[None, :, None, None]
    return out * mask[None, :, None, None]


# -------------------------------- main ----------------------------------------
if __name__ == "__main__":
    # Module config (layer_id=0 -> widths [4, 8, 12, 16]).
    layer_id = 0
    max_in_channels = 4
    max_out_channels = SuperNetSetting[layer_id][-1]    # 16
    kernel_size = 3
    stride = 1
    out_channel = 12                                    # active sub-network width

    key = jax.random.PRNGKey(0)
    kx, kw = jax.random.split(key, 2)

    # Input (NCHW, as in PyTorch).
    N, H, W = 2, 16, 16
    x = jax.random.normal(kx, (N, max_in_channels, H, W), dtype=jnp.float32)

    # Deterministic parameter init (Conv2d kaiming-uniform-like bound; BN defaults).
    fan_in = max_in_channels * kernel_size * kernel_size
    bound = 1.0 / (fan_in ** 0.5)
    weight = jax.random.uniform(
        kw, (max_out_channels, max_in_channels, kernel_size, kernel_size),
        minval=-bound, maxval=bound, dtype=jnp.float32)
    gamma = jnp.ones((max_out_channels,), jnp.float32)
    beta = jnp.zeros((max_out_channels,), jnp.float32)

    # Channel mask for the selected out_channel (masks buffer, index lookup).
    index = SuperNetSetting[layer_id].index(out_channel)
    mask = (jnp.arange(max_out_channels) <
            SuperNetSetting[layer_id][index]).astype(jnp.float32)

    fwd = jax.jit(functools.partial(masked_conv2d_bn,
                                    kernel_size=kernel_size, stride=stride))
    out = jax.block_until_ready(fwd(x, weight, gamma, beta, mask))

    ref = _reference(x, weight, gamma, beta, mask,
                     kernel_size=kernel_size, stride=stride)
    assert out.shape == (N, max_out_channels, H, W)
    assert jnp.allclose(out, ref, atol=1e-3, rtol=1e-3), "mismatch vs reference"

    print("KERNEL_OK")
</pallas_src>

<mosaic_0001>
module attributes {stable_mosaic.version = 11 : i64} {
  func.func @_stats_kernel(%arg0: i32, %arg1: memref<1x4x290xbf16, #tpu.memory_space<vmem>>, %arg2: memref<9x16x4xbf16, #tpu.memory_space<vmem>>, %arg3: memref<3x256xbf16, #tpu.memory_space<vmem>>, %arg4: memref<1x16x1xf32, #tpu.memory_space<vmem>>, %arg5: memref<1x16x1xf32, #tpu.memory_space<vmem>>) attributes {dimension_semantics = [#tpu.dimension_semantics<parallel>], iteration_bounds = array<i64: 2>, scalar_prefetch = 0 : i64, scratch_operands = 0 : i64, tpu.core_type = #tpu.core_type<tc>, window_params = [{transform_indices = @transform_0, window_bounds = array<i64: 1, 4, 290>}, {pipeline_mode = #tpu.pipeline_mode<synchronous>, transform_indices = @transform_1, window_bounds = array<i64: 9, 16, 4>}, {pipeline_mode = #tpu.pipeline_mode<synchronous>, transform_indices = @transform_2, window_bounds = array<i64: 3, 256>}, {transform_indices = @transform_3, window_bounds = array<i64: 1, 16, 1>}, {transform_indices = @transform_4, window_bounds = array<i64: 1, 16, 1>}]} {
    %c0 = arith.constant 0 : index
    %c0_0 = arith.constant 0 : index
    %c0_1 = arith.constant 0 : index
    %0 = vector.load %arg1[%c0, %c0_0, %c0_1] : memref<1x4x290xbf16, #tpu.memory_space<vmem>>, vector<1x4x290xbf16>
    %1 = vector.shape_cast %0 : vector<1x4x290xbf16> to vector<4x290xbf16>
    %cst = arith.constant 0.000000e+00 : f32
    %2 = vector.broadcast %cst : f32 to vector<16x256xf32>
    %3 = vector.extract_strided_slice %1 {offsets = [0, 0], sizes = [4, 256], strides = [1, 1]} : vector<4x290xbf16> to vector<4x256xbf16>
    %c0_2 = arith.constant 0 : index
    %c0_3 = arith.constant 0 : index
    %4 = vector.load %arg3[%c0_2, %c0_3] : memref<3x256xbf16, #tpu.memory_space<vmem>>, vector<1x256xbf16>
    %5 = vector.broadcast %4 : vector<1x256xbf16> to vector<4x256xbf16>
    %6 = arith.mulf %3, %5 : vector<4x256xbf16>
    %c0_4 = arith.constant 0 : index
    %c0_5 = arith.constant 0 : index
    %c0_6 = arith.constant 0 : index
    %7 = vector.load %arg2[%c0_4, %c0_5, %c0_6] : memref<9x16x4xbf16, #tpu.memory_space<vmem>>, vector<1x16x4xbf16>
    %8 = vector.shape_cast %7 : vector<1x16x4xbf16> to vector<16x4xbf16>
    %cst_7 = arith.constant dense<0.000000e+00> : vector<16x256xf32>
    %9 = tpu.matmul %8, %6, %cst_7 {dimension_numbers = #tpu.dot_dimension_numbers<[1], [0], [0], [1], [0, 0, 1, 1], [], []>} : vector<16x4xbf16>, vector<4x256xbf16>, vector<16x256xf32> -> vector<16x256xf32>
    %10 = arith.addf %2, %9 : vector<16x256xf32>
    %11 = vector.extract_strided_slice %1 {offsets = [0, 1], sizes = [4, 256], strides = [1, 1]} : vector<4x290xbf16> to vector<4x256xbf16>
    %c1 = arith.constant 1 : index
    %c0_8 = arith.constant 0 : index
    %12 = vector.load %arg3[%c1, %c0_8] : memref<3x256xbf16, #tpu.memory_space<vmem>>, vector<1x256xbf16>
    %13 = vector.broadcast %12 : vector<1x256xbf16> to vector<4x256xbf16>
    %14 = arith.mulf %11, %13 : vector<4x256xbf16>
    %c1_9 = arith.constant 1 : index
    %c0_10 = arith.constant 0 : index
    %c0_11 = arith.constant 0 : index
    %15 = vector.load %arg2[%c1_9, %c0_10, %c0_11] : memref<9x16x4xbf16, #tpu.memory_space<vmem>>, vector<1x16x4xbf16>
    %16 = vector.shape_cast %15 : vector<1x16x4xbf16> to vector<16x4xbf16>
    %cst_12 = arith.constant dense<0.000000e+00> : vector<16x256xf32>
    %17 = tpu.matmul %16, %14, %cst_12 {dimension_numbers = #tpu.dot_dimension_numbers<[1], [0], [0], [1], [0, 0, 1, 1], [], []>} : vector<16x4xbf16>, vector<4x256xbf16>, vector<16x256xf32> -> vector<16x256xf32>
    %18 = arith.addf %10, %17 : vector<16x256xf32>
    %19 = vector.extract_strided_slice %1 {offsets = [0, 2], sizes = [4, 256], strides = [1, 1]} : vector<4x290xbf16> to vector<4x256xbf16>
    %c2 = arith.constant 2 : index
    %c0_13 = arith.constant 0 : index
    %20 = vector.load %arg3[%c2, %c0_13] : memref<3x256xbf16, #tpu.memory_space<vmem>>, vector<1x256xbf16>
    %21 = vector.broadcast %20 : vector<1x256xbf16> to vector<4x256xbf16>
    %22 = arith.mulf %19, %21 : vector<4x256xbf16>
    %c2_14 = arith.constant 2 : index
    %c0_15 = arith.constant 0 : index
    %c0_16 = arith.constant 0 : index
    %23 = vector.load %arg2[%c2_14, %c0_15, %c0_16] : memref<9x16x4xbf16, #tpu.memory_space<vmem>>, vector<1x16x4xbf16>
    %24 = vector.shape_cast %23 : vector<1x16x4xbf16> to vector<16x4xbf16>
    %cst_17 = arith.constant dense<0.000000e+00> : vector<16x256xf32>
    %25 = tpu.matmul %24, %22, %cst_17 {dimension_numbers = #tpu.dot_dimension_numbers<[1], [0], [0], [1], [0, 0, 1, 1], [], []>} : vector<16x4xbf16>, vector<4x256xbf16>, vector<16x256xf32> -> vector<16x256xf32>
    %26 = arith.addf %18, %25 : vector<16x256xf32>
    %27 = vector.extract_strided_slice %1 {offsets = [0, 16], sizes = [4, 256], strides = [1, 1]} : vector<4x290xbf16> to vector<4x256xbf16>
    %c0_18 = arith.constant 0 : index
    %c0_19 = arith.constant 0 : index
    %28 = vector.load %arg3[%c0_18, %c0_19] : memref<3x256xbf16, #tpu.memory_space<vmem>>, vector<1x256xbf16>
    %29 = vector.broadcast %28 : vector<1x256xbf16> to vector<4x256xbf16>
    %30 = arith.mulf %27, %29 : vector<4x256xbf16>
    %c3 = arith.constant 3 : index
    %c0_20 = arith.constant 0 : index
    %c0_21 = arith.constant 0 : index
    %31 = vector.load %arg2[%c3, %c0_20, %c0_21] : memref<9x16x4xbf16, #tpu.memory_space<vmem>>, vector<1x16x4xbf16>
    %32 = vector.shape_cast %31 : vector<1x16x4xbf16> to vector<16x4xbf16>
    %cst_22 = arith.constant dense<0.000000e+00> : vector<16x256xf32>
    %33 = tpu.matmul %32, %30, %cst_22 {dimension_numbers = #tpu.dot_dimension_numbers<[1], [0], [0], [1], [0, 0, 1, 1], [], []>} : vector<16x4xbf16>, vector<4x256xbf16>, vector<16x256xf32> -> vector<16x256xf32>
    %34 = arith.addf %26, %33 : vector<16x256xf32>
    %35 = vector.extract_strided_slice %1 {offsets = [0, 17], sizes = [4, 256], strides = [1, 1]} : vector<4x290xbf16> to vector<4x256xbf16>
    %c1_23 = arith.constant 1 : index
    %c0_24 = arith.constant 0 : index
    %36 = vector.load %arg3[%c1_23, %c0_24] : memref<3x256xbf16, #tpu.memory_space<vmem>>, vector<1x256xbf16>
    %37 = vector.broadcast %36 : vector<1x256xbf16> to vector<4x256xbf16>
    %38 = arith.mulf %35, %37 : vector<4x256xbf16>
    %c4 = arith.constant 4 : index
    %c0_25 = arith.constant 0 : index
    %c0_26 = arith.constant 0 : index
    %39 = vector.load %arg2[%c4, %c0_25, %c0_26] : memref<9x16x4xbf16, #tpu.memory_space<vmem>>, vector<1x16x4xbf16>
    %40 = vector.shape_cast %39 : vector<1x16x4xbf16> to vector<16x4xbf16>
    %cst_27 = arith.constant dense<0.000000e+00> : vector<16x256xf32>
    %41 = tpu.matmul %40, %38, %cst_27 {dimension_numbers = #tpu.dot_dimension_numbers<[1], [0], [0], [1], [0, 0, 1, 1], [], []>} : vector<16x4xbf16>, vector<4x256xbf16>, vector<16x256xf32> -> vector<16x256xf32>
    %42 = arith.addf %34, %41 : vector<16x256xf32>
    %43 = vector.extract_strided_slice %1 {offsets = [0, 18], sizes = [4, 256], strides = [1, 1]} : vector<4x290xbf16> to vector<4x256xbf16>
    %c2_28 = arith.constant 2 : index
    %c0_29 = arith.constant 0 : index
    %44 = vector.load %arg3[%c2_28, %c0_29] : memref<3x256xbf16, #tpu.memory_space<vmem>>, vector<1x256xbf16>
    %45 = vector.broadcast %44 : vector<1x256xbf16> to vector<4x256xbf16>
    %46 = arith.mulf %43, %45 : vector<4x256xbf16>
    %c5 = arith.constant 5 : index
    %c0_30 = arith.constant 0 : index
    %c0_31 = arith.constant 0 : index
    %47 = vector.load %arg2[%c5, %c0_30, %c0_31] : memref<9x16x4xbf16, #tpu.memory_space<vmem>>, vector<1x16x4xbf16>
    %48 = vector.shape_cast %47 : vector<1x16x4xbf16> to vector<16x4xbf16>
    %cst_32 = arith.constant dense<0.000000e+00> : vector<16x256xf32>
    %49 = tpu.matmul %48, %46, %cst_32 {dimension_numbers = #tpu.dot_dimension_numbers<[1], [0], [0], [1], [0, 0, 1, 1], [], []>} : vector<16x4xbf16>, vector<4x256xbf16>, vector<16x256xf32> -> vector<16x256xf32>
    %50 = arith.addf %42, %49 : vector<16x256xf32>
    %51 = vector.extract_strided_slice %1 {offsets = [0, 32], sizes = [4, 256], strides = [1, 1]} : vector<4x290xbf16> to vector<4x256xbf16>
    %c0_33 = arith.constant 0 : index
    %c0_34 = arith.constant 0 : index
    %52 = vector.load %arg3[%c0_33, %c0_34] : memref<3x256xbf16, #tpu.memory_space<vmem>>, vector<1x256xbf16>
    %53 = vector.broadcast %52 : vector<1x256xbf16> to vector<4x256xbf16>
    %54 = arith.mulf %51, %53 : vector<4x256xbf16>
    %c6 = arith.constant 6 : index
    %c0_35 = arith.constant 0 : index
    %c0_36 = arith.constant 0 : index
    %55 = vector.load %arg2[%c6, %c0_35, %c0_36] : memref<9x16x4xbf16, #tpu.memory_space<vmem>>, vector<1x16x4xbf16>
    %56 = vector.shape_cast %55 : vector<1x16x4xbf16> to vector<16x4xbf16>
    %cst_37 = arith.constant dense<0.000000e+00> : vector<16x256xf32>
    %57 = tpu.matmul %56, %54, %cst_37 {dimension_numbers = #tpu.dot_dimension_numbers<[1], [0], [0], [1], [0, 0, 1, 1], [], []>} : vector<16x4xbf16>, vector<4x256xbf16>, vector<16x256xf32> -> vector<16x256xf32>
    %58 = arith.addf %50, %57 : vector<16x256xf32>
    %59 = vector.extract_strided_slice %1 {offsets = [0, 33], sizes = [4, 256], strides = [1, 1]} : vector<4x290xbf16> to vector<4x256xbf16>
    %c1_38 = arith.constant 1 : index
    %c0_39 = arith.constant 0 : index
    %60 = vector.load %arg3[%c1_38, %c0_39] : memref<3x256xbf16, #tpu.memory_space<vmem>>, vector<1x256xbf16>
    %61 = vector.broadcast %60 : vector<1x256xbf16> to vector<4x256xbf16>
    %62 = arith.mulf %59, %61 : vector<4x256xbf16>
    %c7 = arith.constant 7 : index
    %c0_40 = arith.constant 0 : index
    %c0_41 = arith.constant 0 : index
    %63 = vector.load %arg2[%c7, %c0_40, %c0_41] : memref<9x16x4xbf16, #tpu.memory_space<vmem>>, vector<1x16x4xbf16>
    %64 = vector.shape_cast %63 : vector<1x16x4xbf16> to vector<16x4xbf16>
    %cst_42 = arith.constant dense<0.000000e+00> : vector<16x256xf32>
    %65 = tpu.matmul %64, %62, %cst_42 {dimension_numbers = #tpu.dot_dimension_numbers<[1], [0], [0], [1], [0, 0, 1, 1], [], []>} : vector<16x4xbf16>, vector<4x256xbf16>, vector<16x256xf32> -> vector<16x256xf32>
    %66 = arith.addf %58, %65 : vector<16x256xf32>
    %67 = vector.extract_strided_slice %1 {offsets = [0, 34], sizes = [4, 256], strides = [1, 1]} : vector<4x290xbf16> to vector<4x256xbf16>
    %c2_43 = arith.constant 2 : index
    %c0_44 = arith.constant 0 : index
    %68 = vector.load %arg3[%c2_43, %c0_44] : memref<3x256xbf16, #tpu.memory_space<vmem>>, vector<1x256xbf16>
    %69 = vector.broadcast %68 : vector<1x256xbf16> to vector<4x256xbf16>
    %70 = arith.mulf %67, %69 : vector<4x256xbf16>
    %c8 = arith.constant 8 : index
    %c0_45 = arith.constant 0 : index
    %c0_46 = arith.constant 0 : index
    %71 = vector.load %arg2[%c8, %c0_45, %c0_46] : memref<9x16x4xbf16, #tpu.memory_space<vmem>>, vector<1x16x4xbf16>
    %72 = vector.shape_cast %71 : vector<1x16x4xbf16> to vector<16x4xbf16>
    %cst_47 = arith.constant dense<0.000000e+00> : vector<16x256xf32>
    %73 = tpu.matmul %72, %70, %cst_47 {dimension_numbers = #tpu.dot_dimension_numbers<[1], [0], [0], [1], [0, 0, 1, 1], [], []>} : vector<16x4xbf16>, vector<4x256xbf16>, vector<16x256xf32> -> vector<16x256xf32>
    %74 = arith.addf %66, %73 : vector<16x256xf32>
    %cst_48 = arith.constant dense<0.000000e+00> : vector<16xf32>
    %75 = vector.multi_reduction <add>, %74, %cst_48 [1] : vector<16x256xf32> to vector<16xf32>
    %76 = vector.shape_cast %75 : vector<16xf32> to vector<16x1xf32>
    %c0_49 = arith.constant 0 : index
    %c0_50 = arith.constant 0 : index
    %c0_51 = arith.constant 0 : index
    %77 = vector.load %arg4[%c0_49, %c0_50, %c0_51] : memref<1x16x1xf32, #tpu.memory_space<vmem>>, vector<1x16x1xf32>
    %78 = vector.shape_cast %77 : vector<1x16x1xf32> to vector<16x1xf32>
    %79 = vector.shape_cast %76 : vector<16x1xf32> to vector<1x16x1xf32>
    tpu.vector_store %arg4[%c0_49, %c0_50, %c0_51], %79 {strides = array<i32>} : memref<1x16x1xf32, #tpu.memory_space<vmem>>, vector<1x16x1xf32>,
    %80 = arith.mulf %74, %74 : vector<16x256xf32>
    %cst_52 = arith.constant dense<0.000000e+00> : vector<16xf32>
    %81 = vector.multi_reduction <add>, %80, %cst_52 [1] : vector<16x256xf32> to vector<16xf32>
    %82 = vector.shape_cast %81 : vector<16xf32> to vector<16x1xf32>
    %c0_53 = arith.constant 0 : index
    %c0_54 = arith.constant 0 : index
    %c0_55 = arith.constant 0 : index
    %83 = vector.load %arg5[%c0_53, %c0_54, %c0_55] : memref<1x16x1xf32, #tpu.memory_space<vmem>>, vector<1x16x1xf32>
    %84 = vector.shape_cast %83 : vector<1x16x1xf32> to vector<16x1xf32>
    %85 = vector.shape_cast %82 : vector<16x1xf32> to vector<1x16x1xf32>
    tpu.vector_store %arg5[%c0_53, %c0_54, %c0_55], %85 {strides = array<i32>} : memref<1x16x1xf32, #tpu.memory_space<vmem>>, vector<1x16x1xf32>,
    return
  }
  func.func @transform_0(%arg0: i32) -> (i32, i32, i32) {
    %c0_i32 = arith.constant 0 : i32
    %c0_i32_0 = arith.constant 0 : i32
    %c0_i32_1 = arith.constant 0 : i32
    return %arg0, %c0_i32, %c0_i32_0 : i32, i32, i32
  }
  func.func @transform_1(%arg0: i32) -> (i32, i32, i32) {
    %c0_i32 = arith.constant 0 : i32
    %c0_i32_0 = arith.constant 0 : i32
    %c0_i32_1 = arith.constant 0 : i32
    %c0_i32_2 = arith.constant 0 : i32
    return %c0_i32, %c0_i32_0, %c0_i32_1 : i32, i32, i32
  }
  func.func @transform_2(%arg0: i32) -> (i32, i32) {
    %c0_i32 = arith.constant 0 : i32
    %c0_i32_0 = arith.constant 0 : i32
    %c0_i32_1 = arith.constant 0 : i32
    return %c0_i32, %c0_i32_0 : i32, i32
  }
  func.func @transform_3(%arg0: i32) -> (i32, i32, i32) {
    %c0_i32 = arith.constant 0 : i32
    %c0_i32_0 = arith.constant 0 : i32
    %c0_i32_1 = arith.constant 0 : i32
    return %arg0, %c0_i32, %c0_i32_0 : i32, i32, i32
  }
  func.func @transform_4(%arg0: i32) -> (i32, i32, i32) {
    %c0_i32 = arith.constant 0 : i32
    %c0_i32_0 = arith.constant 0 : i32
    %c0_i32_1 = arith.constant 0 : i32
    return %arg0, %c0_i32, %c0_i32_0 : i32, i32, i32
  }
}

module attributes {stable_mosaic.version = 11 : i64} {
  func.func @_apply_kernel(%arg0: i32, %arg1: memref<1x4x290xbf16, #tpu.memory_space<vmem>>, %arg2: memref<9x16x4xbf16, #tpu.memory_space<vmem>>, %arg3: memref<3x256xbf16, #tpu.memory_space<vmem>>, %arg4: memref<16x1xf32, #tpu.memory_space<vmem>>, %arg5: memref<16x1xf32, #tpu.memory_space<vmem>>, %arg6: memref<1x16x256xf32, #tpu.memory_space<vmem>>) attributes {dimension_semantics = [#tpu.dimension_semantics<parallel>], iteration_bounds = array<i64: 2>, scalar_prefetch = 0 : i64, scratch_operands = 0 : i64, tpu.core_type = #tpu.core_type<tc>, window_params = [{transform_indices = @transform_0, window_bounds = array<i64: 1, 4, 290>}, {pipeline_mode = #tpu.pipeline_mode<synchronous>, transform_indices = @transform_1, window_bounds = array<i64: 9, 16, 4>}, {pipeline_mode = #tpu.pipeline_mode<synchronous>, transform_indices = @transform_2, window_bounds = array<i64: 3, 256>}, {pipeline_mode = #tpu.pipeline_mode<synchronous>, transform_indices = @transform_3, window_bounds = array<i64: 16, 1>}, {pipeline_mode = #tpu.pipeline_mode<synchronous>, transform_indices = @transform_4, window_bounds = array<i64: 16, 1>}, {transform_indices = @transform_5, window_bounds = array<i64: 1, 16, 256>}]} {
    %c0 = arith.constant 0 : index
    %c0_0 = arith.constant 0 : index
    %c0_1 = arith.constant 0 : index
    %0 = vector.load %arg1[%c0, %c0_0, %c0_1] : memref<1x4x290xbf16, #tpu.memory_space<vmem>>, vector<1x4x290xbf16>
    %1 = vector.shape_cast %0 : vector<1x4x290xbf16> to vector<4x290xbf16>
    %cst = arith.constant 0.000000e+00 : f32
    %2 = vector.broadcast %cst : f32 to vector<16x256xf32>
    %3 = vector.extract_strided_slice %1 {offsets = [0, 0], sizes = [4, 256], strides = [1, 1]} : vector<4x290xbf16> to vector<4x256xbf16>
    %c0_2 = arith.constant 0 : index
    %c0_3 = arith.constant 0 : index
    %4 = vector.load %arg3[%c0_2, %c0_3] : memref<3x256xbf16, #tpu.memory_space<vmem>>, vector<1x256xbf16>
    %5 = vector.broadcast %4 : vector<1x256xbf16> to vector<4x256xbf16>
    %6 = arith.mulf %3, %5 : vector<4x256xbf16>
    %c0_4 = arith.constant 0 : index
    %c0_5 = arith.constant 0 : index
    %c0_6 = arith.constant 0 : index
    %7 = vector.load %arg2[%c0_4, %c0_5, %c0_6] : memref<9x16x4xbf16, #tpu.memory_space<vmem>>, vector<1x16x4xbf16>
    %8 = vector.shape_cast %7 : vector<1x16x4xbf16> to vector<16x4xbf16>
    %cst_7 = arith.constant dense<0.000000e+00> : vector<16x256xf32>
    %9 = tpu.matmul %8, %6, %cst_7 {dimension_numbers = #tpu.dot_dimension_numbers<[1], [0], [0], [1], [0, 0, 1, 1], [], []>} : vector<16x4xbf16>, vector<4x256xbf16>, vector<16x256xf32> -> vector<16x256xf32>
    %10 = arith.addf %2, %9 : vector<16x256xf32>
    %11 = vector.extract_strided_slice %1 {offsets = [0, 1], sizes = [4, 256], strides = [1, 1]} : vector<4x290xbf16> to vector<4x256xbf16>
    %c1 = arith.constant 1 : index
    %c0_8 = arith.constant 0 : index
    %12 = vector.load %arg3[%c1, %c0_8] : memref<3x256xbf16, #tpu.memory_space<vmem>>, vector<1x256xbf16>
    %13 = vector.broadcast %12 : vector<1x256xbf16> to vector<4x256xbf16>
    %14 = arith.mulf %11, %13 : vector<4x256xbf16>
    %c1_9 = arith.constant 1 : index
    %c0_10 = arith.constant 0 : index
    %c0_11 = arith.constant 0 : index
    %15 = vector.load %arg2[%c1_9, %c0_10, %c0_11] : memref<9x16x4xbf16, #tpu.memory_space<vmem>>, vector<1x16x4xbf16>
    %16 = vector.shape_cast %15 : vector<1x16x4xbf16> to vector<16x4xbf16>
    %cst_12 = arith.constant dense<0.000000e+00> : vector<16x256xf32>
    %17 = tpu.matmul %16, %14, %cst_12 {dimension_numbers = #tpu.dot_dimension_numbers<[1], [0], [0], [1], [0, 0, 1, 1], [], []>} : vector<16x4xbf16>, vector<4x256xbf16>, vector<16x256xf32> -> vector<16x256xf32>
    %18 = arith.addf %10, %17 : vector<16x256xf32>
    %19 = vector.extract_strided_slice %1 {offsets = [0, 2], sizes = [4, 256], strides = [1, 1]} : vector<4x290xbf16> to vector<4x256xbf16>
    %c2 = arith.constant 2 : index
    %c0_13 = arith.constant 0 : index
    %20 = vector.load %arg3[%c2, %c0_13] : memref<3x256xbf16, #tpu.memory_space<vmem>>, vector<1x256xbf16>
    %21 = vector.broadcast %20 : vector<1x256xbf16> to vector<4x256xbf16>
    %22 = arith.mulf %19, %21 : vector<4x256xbf16>
    %c2_14 = arith.constant 2 : index
    %c0_15 = arith.constant 0 : index
    %c0_16 = arith.constant 0 : index
    %23 = vector.load %arg2[%c2_14, %c0_15, %c0_16] : memref<9x16x4xbf16, #tpu.memory_space<vmem>>, vector<1x16x4xbf16>
    %24 = vector.shape_cast %23 : vector<1x16x4xbf16> to vector<16x4xbf16>
    %cst_17 = arith.constant dense<0.000000e+00> : vector<16x256xf32>
    %25 = tpu.matmul %24, %22, %cst_17 {dimension_numbers = #tpu.dot_dimension_numbers<[1], [0], [0], [1], [0, 0, 1, 1], [], []>} : vector<16x4xbf16>, vector<4x256xbf16>, vector<16x256xf32> -> vector<16x256xf32>
    %26 = arith.addf %18, %25 : vector<16x256xf32>
    %27 = vector.extract_strided_slice %1 {offsets = [0, 16], sizes = [4, 256], strides = [1, 1]} : vector<4x290xbf16> to vector<4x256xbf16>
    %c0_18 = arith.constant 0 : index
    %c0_19 = arith.constant 0 : index
    %28 = vector.load %arg3[%c0_18, %c0_19] : memref<3x256xbf16, #tpu.memory_space<vmem>>, vector<1x256xbf16>
    %29 = vector.broadcast %28 : vector<1x256xbf16> to vector<4x256xbf16>
    %30 = arith.mulf %27, %29 : vector<4x256xbf16>
    %c3 = arith.constant 3 : index
    %c0_20 = arith.constant 0 : index
    %c0_21 = arith.constant 0 : index
    %31 = vector.load %arg2[%c3, %c0_20, %c0_21] : memref<9x16x4xbf16, #tpu.memory_space<vmem>>, vector<1x16x4xbf16>
    %32 = vector.shape_cast %31 : vector<1x16x4xbf16> to vector<16x4xbf16>
    %cst_22 = arith.constant dense<0.000000e+00> : vector<16x256xf32>
    %33 = tpu.matmul %32, %30, %cst_22 {dimension_numbers = #tpu.dot_dimension_numbers<[1], [0], [0], [1], [0, 0, 1, 1], [], []>} : vector<16x4xbf16>, vector<4x256xbf16>, vector<16x256xf32> -> vector<16x256xf32>
    %34 = arith.addf %26, %33 : vector<16x256xf32>
    %35 = vector.extract_strided_slice %1 {offsets = [0, 17], sizes = [4, 256], strides = [1, 1]} : vector<4x290xbf16> to vector<4x256xbf16>
    %c1_23 = arith.constant 1 : index
    %c0_24 = arith.constant 0 : index
    %36 = vector.load %arg3[%c1_23, %c0_24] : memref<3x256xbf16, #tpu.memory_space<vmem>>, vector<1x256xbf16>
    %37 = vector.broadcast %36 : vector<1x256xbf16> to vector<4x256xbf16>
    %38 = arith.mulf %35, %37 : vector<4x256xbf16>
    %c4 = arith.constant 4 : index
    %c0_25 = arith.constant 0 : index
    %c0_26 = arith.constant 0 : index
    %39 = vector.load %arg2[%c4, %c0_25, %c0_26] : memref<9x16x4xbf16, #tpu.memory_space<vmem>>, vector<1x16x4xbf16>
    %40 = vector.shape_cast %39 : vector<1x16x4xbf16> to vector<16x4xbf16>
    %cst_27 = arith.constant dense<0.000000e+00> : vector<16x256xf32>
    %41 = tpu.matmul %40, %38, %cst_27 {dimension_numbers = #tpu.dot_dimension_numbers<[1], [0], [0], [1], [0, 0, 1, 1], [], []>} : vector<16x4xbf16>, vector<4x256xbf16>, vector<16x256xf32> -> vector<16x256xf32>
    %42 = arith.addf %34, %41 : vector<16x256xf32>
    %43 = vector.extract_strided_slice %1 {offsets = [0, 18], sizes = [4, 256], strides = [1, 1]} : vector<4x290xbf16> to vector<4x256xbf16>
    %c2_28 = arith.constant 2 : index
    %c0_29 = arith.constant 0 : index
    %44 = vector.load %arg3[%c2_28, %c0_29] : memref<3x256xbf16, #tpu.memory_space<vmem>>, vector<1x256xbf16>
    %45 = vector.broadcast %44 : vector<1x256xbf16> to vector<4x256xbf16>
    %46 = arith.mulf %43, %45 : vector<4x256xbf16>
    %c5 = arith.constant 5 : index
    %c0_30 = arith.constant 0 : index
    %c0_31 = arith.constant 0 : index
    %47 = vector.load %arg2[%c5, %c0_30, %c0_31] : memref<9x16x4xbf16, #tpu.memory_space<vmem>>, vector<1x16x4xbf16>
    %48 = vector.shape_cast %47 : vector<1x16x4xbf16> to vector<16x4xbf16>
    %cst_32 = arith.constant dense<0.000000e+00> : vector<16x256xf32>
    %49 = tpu.matmul %48, %46, %cst_32 {dimension_numbers = #tpu.dot_dimension_numbers<[1], [0], [0], [1], [0, 0, 1, 1], [], []>} : vector<16x4xbf16>, vector<4x256xbf16>, vector<16x256xf32> -> vector<16x256xf32>
    %50 = arith.addf %42, %49 : vector<16x256xf32>
    %51 = vector.extract_strided_slice %1 {offsets = [0, 32], sizes = [4, 256], strides = [1, 1]} : vector<4x290xbf16> to vector<4x256xbf16>
    %c0_33 = arith.constant 0 : index
    %c0_34 = arith.constant 0 : index
    %52 = vector.load %arg3[%c0_33, %c0_34] : memref<3x256xbf16, #tpu.memory_space<vmem>>, vector<1x256xbf16>
    %53 = vector.broadcast %52 : vector<1x256xbf16> to vector<4x256xbf16>
    %54 = arith.mulf %51, %53 : vector<4x256xbf16>
    %c6 = arith.constant 6 : index
    %c0_35 = arith.constant 0 : index
    %c0_36 = arith.constant 0 : index
    %55 = vector.load %arg2[%c6, %c0_35, %c0_36] : memref<9x16x4xbf16, #tpu.memory_space<vmem>>, vector<1x16x4xbf16>
    %56 = vector.shape_cast %55 : vector<1x16x4xbf16> to vector<16x4xbf16>
    %cst_37 = arith.constant dense<0.000000e+00> : vector<16x256xf32>
    %57 = tpu.matmul %56, %54, %cst_37 {dimension_numbers = #tpu.dot_dimension_numbers<[1], [0], [0], [1], [0, 0, 1, 1], [], []>} : vector<16x4xbf16>, vector<4x256xbf16>, vector<16x256xf32> -> vector<16x256xf32>
    %58 = arith.addf %50, %57 : vector<16x256xf32>
    %59 = vector.extract_strided_slice %1 {offsets = [0, 33], sizes = [4, 256], strides = [1, 1]} : vector<4x290xbf16> to vector<4x256xbf16>
    %c1_38 = arith.constant 1 : index
    %c0_39 = arith.constant 0 : index
    %60 = vector.load %arg3[%c1_38, %c0_39] : memref<3x256xbf16, #tpu.memory_space<vmem>>, vector<1x256xbf16>
    %61 = vector.broadcast %60 : vector<1x256xbf16> to vector<4x256xbf16>
    %62 = arith.mulf %59, %61 : vector<4x256xbf16>
    %c7 = arith.constant 7 : index
    %c0_40 = arith.constant 0 : index
    %c0_41 = arith.constant 0 : index
    %63 = vector.load %arg2[%c7, %c0_40, %c0_41] : memref<9x16x4xbf16, #tpu.memory_space<vmem>>, vector<1x16x4xbf16>
    %64 = vector.shape_cast %63 : vector<1x16x4xbf16> to vector<16x4xbf16>
    %cst_42 = arith.constant dense<0.000000e+00> : vector<16x256xf32>
    %65 = tpu.matmul %64, %62, %cst_42 {dimension_numbers = #tpu.dot_dimension_numbers<[1], [0], [0], [1], [0, 0, 1, 1], [], []>} : vector<16x4xbf16>, vector<4x256xbf16>, vector<16x256xf32> -> vector<16x256xf32>
    %66 = arith.addf %58, %65 : vector<16x256xf32>
    %67 = vector.extract_strided_slice %1 {offsets = [0, 34], sizes = [4, 256], strides = [1, 1]} : vector<4x290xbf16> to vector<4x256xbf16>
    %c2_43 = arith.constant 2 : index
    %c0_44 = arith.constant 0 : index
    %68 = vector.load %arg3[%c2_43, %c0_44] : memref<3x256xbf16, #tpu.memory_space<vmem>>, vector<1x256xbf16>
    %69 = vector.broadcast %68 : vector<1x256xbf16> to vector<4x256xbf16>
    %70 = arith.mulf %67, %69 : vector<4x256xbf16>
    %c8 = arith.constant 8 : index
    %c0_45 = arith.constant 0 : index
    %c0_46 = arith.constant 0 : index
    %71 = vector.load %arg2[%c8, %c0_45, %c0_46] : memref<9x16x4xbf16, #tpu.memory_space<vmem>>, vector<1x16x4xbf16>
    %72 = vector.shape_cast %71 : vector<1x16x4xbf16> to vector<16x4xbf16>
    %cst_47 = arith.constant dense<0.000000e+00> : vector<16x256xf32>
    %73 = tpu.matmul %72, %70, %cst_47 {dimension_numbers = #tpu.dot_dimension_numbers<[1], [0], [0], [1], [0, 0, 1, 1], [], []>} : vector<16x4xbf16>, vector<4x256xbf16>, vector<16x256xf32> -> vector<16x256xf32>
    %74 = arith.addf %66, %73 : vector<16x256xf32>
    %c0_48 = arith.constant 0 : index
    %c0_49 = arith.constant 0 : index
    %75 = vector.load %arg4[%c0_48, %c0_49] : memref<16x1xf32, #tpu.memory_space<vmem>>, vector<16x1xf32>
    %76 = vector.broadcast %75 : vector<16x1xf32> to vector<16x256xf32>
    %77 = arith.mulf %74, %76 : vector<16x256xf32>
    %c0_50 = arith.constant 0 : index
    %c0_51 = arith.constant 0 : index
    %78 = vector.load %arg5[%c0_50, %c0_51] : memref<16x1xf32, #tpu.memory_space<vmem>>, vector<16x1xf32>
    %79 = vector.broadcast %78 : vector<16x1xf32> to vector<16x256xf32>
    %80 = arith.addf %77, %79 : vector<16x256xf32>
    %c0_52 = arith.constant 0 : index
    %c0_53 = arith.constant 0 : index
    %c0_54 = arith.constant 0 : index
    %81 = vector.load %arg6[%c0_52, %c0_53, %c0_54] : memref<1x16x256xf32, #tpu.memory_space<vmem>>, vector<1x16x256xf32>
    %82 = vector.shape_cast %81 : vector<1x16x256xf32> to vector<16x256xf32>
    %83 = vector.shape_cast %80 : vector<16x256xf32> to vector<1x16x256xf32>
    tpu.vector_store %arg6[%c0_52, %c0_53, %c0_54], %83 {strides = array<i32>} : memref<1x16x256xf32, #tpu.memory_space<vmem>>, vector<1x16x256xf32>,
    return
  }
  func.func @transform_0(%arg0: i32) -> (i32, i32, i32) {
    %c0_i32 = arith.constant 0 : i32
    %c0_i32_0 = arith.constant 0 : i32
    %c0_i32_1 = arith.constant 0 : i32
    return %arg0, %c0_i32, %c0_i32_0 : i32, i32, i32
  }
  func.func @transform_1(%arg0: i32) -> (i32, i32, i32) {
    %c0_i32 = arith.constant 0 : i32
    %c0_i32_0 = arith.constant 0 : i32
    %c0_i32_1 = arith.constant 0 : i32
    %c0_i32_2 = arith.constant 0 : i32
    return %c0_i32, %c0_i32_0, %c0_i32_1 : i32, i32, i32
  }
  func.func @transform_2(%arg0: i32) -> (i32, i32) {
    %c0_i32 = arith.constant 0 : i32
    %c0_i32_0 = arith.constant 0 : i32
    %c0_i32_1 = arith.constant 0 : i32
    return %c0_i32, %c0_i32_0 : i32, i32
  }
  func.func @transform_3(%arg0: i32) -> (i32, i32) {
    %c0_i32 = arith.constant 0 : i32
    %c0_i32_0 = arith.constant 0 : i32
    %c0_i32_1 = arith.constant 0 : i32
    return %c0_i32, %c0_i32_0 : i32, i32
  }
  func.func @transform_4(%arg0: i32) -> (i32, i32) {
    %c0_i32 = arith.constant 0 : i32
    %c0_i32_0 = arith.constant 0 : i32
    %c0_i32_1 = arith.constant 0 : i32
    return %c0_i32, %c0_i32_0 : i32, i32
  }
  func.func @transform_5(%arg0: i32) -> (i32, i32, i32) {
    %c0_i32 = arith.constant 0 : i32
    %c0_i32_0 = arith.constant 0 : i32
    %c0_i32_1 = arith.constant 0 : i32
    return %arg0, %c0_i32, %c0_i32_0 : i32, i32, i32
  }
}

</mosaic_0001>

<bundles_post_ra>
// kernel: masked_conv2d_bn.3
= control target key start
LH: loop header
LB: loop body
LE: loop exit
PB: predicated region body
PF: predicated region fallthrough
CT: control target
= control target key end

     0   :  { %s1404_s18 = smov 0   ;;  %s1551_s0 = inlined_call_operand.vmem [shape: bf16[2,4,290], index: 0, kind: input, shape index: {}]   ;;  %s1552_s1 = inlined_call_operand.vmem [shape: bf16[9,16,4], index: 1, kind: input, shape index: {}]   ;;  %s1553_s2 = inlined_call_operand.vmem [shape: bf16[3,256], index: 2, kind: input, shape index: {}]   ;;  %s1554_s3 = inlined_call_operand.vmem [shape: f32[16,1], index: 3, kind: input, shape index: {}]   ;;  %s1555_s4 = inlined_call_operand.vmem [shape: f32[16,1], index: 4, kind: input, shape index: {}]   ;;  %s1556_s5 = inlined_call_operand.vmem [shape: f32[2,16,256], index: 5, kind: output, shape index: {}]  }
   0x1 LB: > { %s1254_s19 = sadd.s32 4294967295, %s1354_s18   ;;  %p1258_p0 = scmp.ge.s32.totalorder %s1354_s18, 1  ;;  %s1354_s18 = sphi %s1404_s18, %s15_s18  }
   0x2   : > { %p187_p1 = scmp.lt.s32.totalorder %s1354_s18, 3 }
   0x4   : > { %p188_p2 = pnand %p1258_p0, %p187_p1 }
   0x5   : > { %s1357_s24 = smov (!%p188_p2), 16   ;;  %s1358_s25 = smov (!%p188_p2), 1  }
   0x6   : > { %191 = sbr.rel (%p188_p2) target bundleno = 520 (0x208), region = 40  ;;  %s1359_s26 = smov (!%p188_p2), 17  }
   0x7   : > { %s1360_s27 = smov (!%p188_p2), 2   ;;  %s1361_s28 = smov (!%p188_p2), 32  }
   0x8   : > { %s1362_s29 = smov (!%p188_p2), 18   ;;  %s1363_s30 = smov (!%p188_p2), 34  }
   0x9   : > { %s1364_s6 = smov (!%p188_p2), 33   ;;  %p215_p3 = scmp.lt.s32.totalorder (!%p188_p2), %s1254_s19, 1 }
   0xa   : > { %s1365_s11 = smov (!%p188_p2), 112   ;;  %s1366_s12 = smov (!%p188_p2), 127  }
   0xb   : > { %v1262_v0 = vld.sshfl [vmem:[%s1553_s2] sm:$0x11 pattern:$0x76325410]  ;;  %v240_v1 = vlaneseq  ;;  %v1356_v3 = vmov 1983009808  }
   0xc   : > { %v236_v2 = vcombine.high %v1262_v0, %v1262_v0  ;;  %v255_v4 = vunpack.c.l.s4 %v1356_v3  ;;  %v265_v5 = vshrl.u32 %v1262_v0, 16  ;;  %v238_v6 = vpack.i.b16 %v1262_v0, %v1262_v0  ;;  %v1271_v8 = vld.sshfl [vmem:[%s1553_s2] sm:$0x22 pattern:$0x76325410]  ;;  %s1558_s19 = smov (!%p215_p3, %s1254_s19), 1 }
   0xd   : > { %v241_v7 = vshrl.u32 %v240_v1, 7  ;;  %v459_v14 = vcombine.high %v1271_v8, %v1271_v8  ;;  %v461_v15 = vpack.i.b16 %v1271_v8, %v1271_v8  ;;  %s1310_s7 = smul.u32 6, %s1558_s19  ;;  %vm584_vm0 = vcmask 130048   ;;  %s1367_s13 = smov 126   ;;  %v1339_v58 = vld [vmem:[%s1552_s1] sm:$0xff]  }
   0xe   : > { %v245_v9 = vpack.i.b16 %v236_v2, %v236_v2  ;;  %v256_v10 = vunpack.c.0.s8 %v255_v4  ;;  %v266_v11 = vpack.i.b16 %v265_v5, %v265_v5  ;;  %v272_v12 = vshrl.u32 %v236_v2, 16  ;;  %s1369_s16 = smov 110   ;;  %s1370_s17 = smov 111  }
   0xf   : > { %v242_v13 = vsub.s32 0, %v241_v7  ;;  %v465_v16 = vsub.s32 1, %v241_v7  ;;  %v468_v24 = vpack.i.b16 %v459_v14, %v459_v14  ;;  %s219_s10 = scalar_lea.vmem %s1551_s0, %s1310_s7  ;;  %vm292_vm1 = vcmask 7168   ;;  %s1371_s20 = smov 96  }
  0x10   : > { %v273_v17 = vpack.i.b16 %v272_v12, %v272_v12  ;;  %v1418_v20 = vsub.s32 %v256_v10, %v241_v7  ;;  %v1433_v33 = vld [vmem:[%s219_s10] sm:$0x3f]  ;;  %vm487_vm2 = vcmask 15360   ;;  %vm334_vm3 = vcmask 1041408   ;;  %s1372_s21 = smov 95   ;;  %s1373_s22 = smov 94  }
  0x11   : > { %v243_v18 = vrot.slane %v238_v6, %v242_v13  ;;  %v250_v19 = vrot.slane %v245_v9, %v242_v13  ;;  %v271_v21 = vrot.slane %v266_v11, %v242_v13  ;;  %v466_v23 = vrot.slane %v461_v15, %v465_v16 }
  0x12   : > { %v278_v22 = vrot.slane %v273_v17, %v242_v13  ;;  %v473_v27 = vrot.slane %v468_v24, %v465_v16  ;;  %v1368_v57 = vmov 0   ;;  %vm778_vm4 = vcmask 146432  }
  0x13   : > { %v253_v25 = vcombine.low %v243_v18, %v250_v19  ;;  %439 = vmatprep.mubr.bf16.mxu1 %v1368_v57  ;;  %373 = vmatprep.mubr.bf16.mxu0 %v1368_v57  ;;  %vm330_vm5 = vcmask 31744   ;;  %vm681_vm6 = vcmask 138240   ;;  %vm875_vm7 = vcmask 261120  }
  0x14   : > { %v281_v26 = vcombine.low %v271_v21, %v278_v22  ;;  %v476_v30 = vcombine.low %v466_v23, %v473_v27  ;;  %1338 = vset.pattern.permute.xlu1 %v1368_v57  ;;  %1337 = vset.pattern.permute.xlu0 %v1368_v57  ;;  %vm972_vm8 = vcmask 269312   ;;  %vm1069_vm9 = vcmask 277504  }
  0x15   : > { %v260_v28 = vrot.slane %v253_v25, %v1418_v20  ;;  %vm619_vm10 = vcmask 916480   ;;  %vm327_vm11 = vcmask 1039360   ;;  %vm522_vm12 = vcmask 1031168  }
  0x16   : > { %v288_v29 = vrot.slane %v281_v26, %v1418_v20  ;;  %v483_v31 = vrot.slane %v476_v30, %v1418_v20  ;;  %vm813_vm13 = vcmask 900096   ;;  %vm716_vm14 = vcmask 908288  }
  0x17   : > { %581 = vrot.lane.b32.xlu1 %v260_v28, %s1357_s24  ;;  %v262_v37 = vmul.bf16 %v260_v28, %v1433_v33  ;;  %vm910_vm15 = vcmask 785408   ;;  %s1309_s24 = sshll.u32 %s1558_s19, 5 }
  0x18   : > { %289 = vrot.lane.b32.xlu0 %v288_v29, %s1358_s25 }
  0x19   : > { %v396_v41 = vrot.slane %v262_v37, %v1418_v20 }
  0x1b   : > { %678 = vrot.lane.b32.xlu1 %v288_v29, %s1359_s26  ;;  %v397_v46 = vcombine.high %v396_v41, %v396_v41  ;;  %v402_v51 = vsel %vm334_vm3, %v396_v41, 0  ;;  %v1180_v41 = vld [vmem:[%s1555_s4 + $0x8] sm:$0xff] }
  0x1c   : > { %484 = vrot.lane.b32.xlu0 %v483_v31, %s1360_s27  ;;  %s224_s27 = scalar_lea.vmem %s1556_s5, %s1309_s24 }
  0x1d   : > { %1269 = vmatprep.subr.msk.bf16.mxu1 %vm334_vm3, %v397_v46 }
  0x1e   : > { %422 = vmatpush1.bf16.msra.mxu1 %v402_v51 }
  0x1f   : > { %872 = vrot.lane.b32.xlu1 %v260_v28, %s1361_s28 }
  0x20   : > { %775 = vrot.lane.b32.xlu0 %v483_v31, %s1362_s29 }
  0x21   : > { %1270 = vmatmul.mubr.msk.bf16.vlgmr.msra.gmra.mxu1 %vm330_vm5, %v1339_v58  ;;  %v1341_v58 = vld [vmem:[%s1552_s1 + $0x18] sm:$0xff]  }
  0x22   : > { %663 = vmatprep.mubr.bf16.mxu1 %v1368_v57 }
  0x23   : > { %1066 = vrot.lane.b32.xlu1 %v483_v31, %s1363_s30 }
  0x24   : > { %969 = vrot.lane.b32.xlu0 %v288_v29, %s1364_s6 }
  0x89   : > { %v582_v32 = vpop.permute.xlu1 %581 }
  0x8a   : > { %v583_v34 = vrot.slane %v582_v32, 6  ;;  %v290_v35 = vpop.permute.xlu0 %289 }
  0x8b   : > { %v291_v36 = vrot.slane %v290_v35, 6 }
  0x8c   : > { %v585_v38 = vsel %vm584_vm0, %v583_v34, %v582_v32  ;;  %vm1007_vm0 = vcmask 777216  }
  0x8d   : > { %v587_v39 = vmul.bf16 %v585_v38, %v1433_v33  ;;  %v293_v40 = vsel %vm292_vm1, %v291_v36, %v290_v35  ;;  %v679_v55 = vpop.permute.xlu1 %678  ;;  %vm1104_vm1 = vcmask 769024  }
  0x8e   : > { %v485_v42 = vpop.permute.xlu0 %484  ;;  %v295_v43 = vmul.bf16 %v293_v40, %v1433_v33  ;;  %v680_v61 = vrot.slane %v679_v55, 6 }
  0x8f   : > { %v486_v44 = vrot.slane %v485_v42, 6  ;;  %v604_v45 = vrot.slane %v587_v39, %v1418_v20  ;;  %v597_v63 = vcombine.high %v587_v39, %v587_v39 }
  0x90   : > { %v312_v49 = vrot.slane %v295_v43, %v1418_v20  ;;  %v305_v59 = vcombine.high %v295_v43, %v295_v43  ;;  %v682_v2 = vsel %vm681_vm6, %v680_v61, %v679_v55  ;;  %v1179_v43 = vld [vmem:[%s1555_s4] sm:$0xff] }
  0x91   : > { %v488_v47 = vsel %vm487_vm2, %v486_v44, %v485_v42  ;;  %613 = vrot.lane.b32.xlu0 %v604_v45, %s1365_s11  ;;  %v612_v1 = vcombine.high %v604_v45, %v604_v45  ;;  %v873_v4 = vpop.permute.xlu1 %872  ;;  %v611_v5 = vrot.slane %v597_v63, %v1418_v20  ;;  %v684_v6 = vmul.bf16 %v682_v2, %v1433_v33  ;;  %v1164_v42 = vld [vmem:[%s1554_s3 + $0x8] sm:$0xff] }
  0x92   : > { %v490_v48 = vmul.bf16 %v488_v47, %v1433_v33  ;;  %v776_v50 = vpop.permute.xlu0 %775  ;;  %v319_v0 = vrot.slane %v305_v59, %v1418_v20  ;;  %v320_v7 = vcombine.high %v312_v49, %v312_v49  ;;  %v874_v8 = vrot.slane %v873_v4, 6 }
  0x93   : > { %v777_v56 = vrot.slane %v776_v50, 6  ;;  %v701_v13 = vrot.slane %v684_v6, %v1418_v20  ;;  %v694_v23 = vcombine.high %v684_v6, %v684_v6 }
  0x94   : > { %v500_v52 = vcombine.high %v490_v48, %v490_v48  ;;  %v507_v53 = vrot.slane %v490_v48, %v1418_v20  ;;  %v876_v12 = vsel %vm875_vm7, %v874_v8, %v873_v4  ;;  %v1344_v8 = vld [vmem:[%s1552_s1 + $0x28] sm:$0xff]  }
  0x95   : > { %321 = vrot.lane.b32.xlu0 %v312_v49, %s1366_s12  ;;  %v779_v62 = vsel %vm778_vm4, %v777_v56, %v776_v50  ;;  %v878_v16 = vmul.bf16 %v876_v12, %v1433_v33  ;;  %v1067_v18 = vpop.permute.xlu1 %1066  ;;  %v709_v21 = vcombine.high %v701_v13, %v701_v13  ;;  %v708_v29 = vrot.slane %v694_v23, %v1418_v20 }
  0x96   : > { %516 = vrot.lane.b32.xlu1 %v507_v53, %s1367_s13  ;;  %v515_v54 = vcombine.high %v507_v53, %v507_v53  ;;  %v514_v60 = vrot.slane %v500_v52, %v1418_v20  ;;  %v781_v3 = vmul.bf16 %v779_v62, %v1433_v33  ;;  %v970_v11 = vpop.permute.xlu0 %969  ;;  %v1068_v24 = vrot.slane %v1067_v18, 6 }
  0x97   : > { %v971_v15 = vrot.slane %v970_v11, 6  ;;  %v895_v22 = vrot.slane %v878_v16, %v1418_v20  ;;  %v888_v27 = vcombine.high %v878_v16, %v878_v16  ;;  %v1343_v16 = vld [vmem:[%s1552_s1 + $0x20] sm:$0xff]  }
  0x98   : > { %v791_v9 = vcombine.high %v781_v3, %v781_v3  ;;  %v798_v10 = vrot.slane %v781_v3, %v1418_v20  ;;  %v1070_v28 = vsel %vm1069_vm9, %v1068_v24, %v1067_v18 }
  0x99   : > { %518 = vrot.lane.b32.xlu0 %v515_v54, %s1367_s13  ;;  %v973_v19 = vsel %vm972_vm8, %v971_v15, %v970_v11  ;;  %v903_v26 = vcombine.high %v895_v22, %v895_v22  ;;  %v1072_v32 = vmul.bf16 %v1070_v28, %v1433_v33  ;;  %v902_v34 = vrot.slane %v888_v27, %v1418_v20 }
  0x9a   : > { %520 = vrot.lane.b32.xlu1 %v514_v60, %s1367_s13  ;;  %v805_v14 = vrot.slane %v791_v9, %v1418_v20  ;;  %v806_v17 = vcombine.high %v798_v10, %v798_v10  ;;  %v975_v25 = vmul.bf16 %v973_v19, %v1433_v33  ;;  %v1163_v33 = vld [vmem:[%s1554_s3] sm:$0xff]  ;;  %v1340_v60 = vld [vmem:[%s1552_s1 + $0x8] sm:$0xff]  }
  0x9b   : > { %v1089_v36 = vrot.slane %v1072_v32, %v1418_v20  ;;  %v1082_v38 = vcombine.high %v1072_v32, %v1072_v32 }
  0x9c   : > { %v985_v30 = vcombine.high %v975_v25, %v975_v25  ;;  %v992_v31 = vrot.slane %v975_v25, %v1418_v20  ;;  %v1345_v25 = vld [vmem:[%s1552_s1 + $0x30] sm:$0xff]  }
  0x9d   : > { %325 = vrot.lane.b32.xlu0 %v319_v0, %s1366_s12  ;;  %v1097_v37 = vcombine.high %v1089_v36, %v1089_v36  ;;  %v1096_v40 = vrot.slane %v1082_v38, %v1418_v20 }
  0x9e   : > { %615 = vrot.lane.b32.xlu1 %v612_v1, %s1365_s11  ;;  %v999_v35 = vrot.slane %v985_v30, %v1418_v20  ;;  %v1000_v39 = vcombine.high %v992_v31, %v992_v31 }
  0xa1   : > { %617 = vrot.lane.b32.xlu0 %v611_v5, %s1365_s11 }
  0xa2   : > { %323 = vrot.lane.b32.xlu1 %v320_v7, %s1366_s12  ;;  %v1342_v7 = vld [vmem:[%s1552_s1 + $0x10] sm:$0xff]  }
  0xa5   : > { %807 = vrot.lane.b32.xlu0 %v798_v10, %s1369_s16 }
  0xa6   : > { %710 = vrot.lane.b32.xlu1 %v701_v13, %s1370_s17 }
  0xa9   : > { %811 = vrot.lane.b32.xlu0 %v805_v14, %s1369_s16 }
  0xaa   : > { %809 = vrot.lane.b32.xlu1 %v806_v17, %s1369_s16 }
  0xad   : > { %712 = vrot.lane.b32.xlu0 %v709_v21, %s1370_s17 }
  0xae   : > { %904 = vrot.lane.b32.xlu1 %v895_v22, %s1371_s20 }
  0xb1   : > { %906 = vrot.lane.b32.xlu0 %v903_v26, %s1371_s20 }
  0xb2   : > { %714 = vrot.lane.b32.xlu1 %v708_v29, %s1370_s17 }
  0xb5   : > { %1001 = vrot.lane.b32.xlu0 %v992_v31, %s1372_s21  ;;  %v1346_v31 = vld [vmem:[%s1552_s1 + $0x38] sm:$0xff]  }
  0xb6   : > { %908 = vrot.lane.b32.xlu1 %v902_v34, %s1371_s20 }
  0xb9   : > { %1005 = vrot.lane.b32.xlu0 %v999_v35, %s1372_s21 }
  0xba   : > { %1098 = vrot.lane.b32.xlu1 %v1089_v36, %s1373_s22 }
  0xbd   : > { %1100 = vrot.lane.b32.xlu0 %v1097_v37, %s1373_s22  ;;  %v1347_v37 = vld [vmem:[%s1552_s1 + $0x40] sm:$0xff]  }
  0xbe   : > { %1003 = vrot.lane.b32.xlu1 %v1000_v39, %s1372_s21 }
  0xc1   : > { %1167 = vperm.xlu0 %1337, %v1163_v33  }
  0xc2   : > { %1102 = vrot.lane.b32.xlu1 %v1096_v40, %s1373_s22 }
  0xc5   : > { %1188 = vperm.xlu0 %1337, %v1180_v41  }
  0xc6   : > { %1172 = vperm.xlu1 %1338, %v1164_v42  }
  0xca   : > { %1183 = vperm.xlu1 %1338, %v1179_v43  }
  0xe1   : > { %v441_v38 = vpop.f32.mrf.mxu1 }
  0xe3   : > { %v443_v39 = vpop.f32.mrf.mxu1 }
  0xe5   : > { %v445_v33 = vpop.f32.mrf.mxu1 }
  0xe7   : > { %v447_v40 = vpop.f32.mrf.mxu1 }
 0x103   : > { %v614_v44 = vpop.permute.xlu0 %613 }
 0x107   : > { %v322_v45 = vpop.permute.xlu0 %321 }
 0x108   : > { %v517_v20 = vpop.permute.xlu1 %516 }
 0x10b   : > { %v519_v46 = vpop.permute.xlu0 %518 }
 0x10c   : > { %v521_v47 = vpop.permute.xlu1 %520  ;;  %v523_v61 = vsel %vm522_vm12, %v517_v20, %v519_v46 }
 0x10d   : > { %v524_v62 = vsel %vm522_vm12, %v519_v46, %v521_v47  ;;  %v529_v1 = vsel %vm334_vm3, %v523_v61, 0 }
 0x10f   : > { %v326_v48 = vpop.permute.xlu0 %325 }
 0x110   : > { %v616_v49 = vpop.permute.xlu1 %615 }
 0x111   : > { %v620_v50 = vsel %vm619_vm10, %v614_v44, %v616_v49 }
 0x112   : > { %v626_v54 = vsel %vm334_vm3, %v620_v50, 0 }
 0x113   : > { %v618_v51 = vpop.permute.xlu0 %617 }
 0x114   : > { %v621_v52 = vsel %vm619_vm10, %v616_v49, %v618_v51  ;;  %v324_v53 = vpop.permute.xlu1 %323 }
 0x115   : > { %1280 = vmatprep.subr.msk.bf16.mxu1 %vm334_vm3, %v621_v52  ;;  %v329_v55 = vsel %vm327_vm11, %v324_v53, %v326_v48  ;;  %v328_v56 = vsel %vm327_vm11, %v322_v45, %v324_v53 }
 0x116   : > { %1266 = vmatprep.subr.msk.bf16.mxu0 %vm334_vm3, %v329_v55  ;;  %646 = vmatpush1.bf16.msra.mxu1 %v626_v54  ;;  %v336_v59 = vsel %vm334_vm3, %v328_v56, 0 }
 0x117   : > { %356 = vmatpush1.bf16.msra.mxu0 %v336_v59  ;;  %v808_v63 = vpop.permute.xlu0 %807 }
 0x118   : > { %v711_v0 = vpop.permute.xlu1 %710  ;;  %1275 = vmatprep.subr.msk.bf16.mxu0 %vm334_vm3, %v524_v62 }
 0x119   : > { %1281 = vmatmul.mubr.msk.bf16.vlgmr.msra.gmra.mxu1 %vm330_vm5, %v1341_v58 }
 0x11a   : > { %1267 = vmatmul.mubr.msk.bf16.vlgmr.msra.gmra.mxu0 %vm330_vm5, %v1340_v60  ;;  %857 = vmatprep.mubr.bf16.mxu1 %v1368_v57 }
 0x11b   : > { %549 = vmatpush1.bf16.msra.mxu0 %v529_v1  ;;  %v812_v2 = vpop.permute.xlu0 %811  ;;  %566 = vmatprep.mubr.bf16.mxu0 %v1368_v57 }
 0x11c   : > { %v810_v3 = vpop.permute.xlu1 %809 }
 0x11d   : > { %v814_v4 = vsel %vm813_vm13, %v808_v63, %v810_v3  ;;  %v815_v5 = vsel %vm813_vm13, %v810_v3, %v812_v2 }
 0x11e   : > { %v820_v6 = vsel %vm334_vm3, %v814_v4, 0  ;;  %1290 = vmatprep.subr.msk.bf16.mxu1 %vm334_vm3, %v815_v5 }
 0x11f   : > { %v713_v9 = vpop.permute.xlu0 %712  ;;  %840 = vmatpush1.bf16.msra.mxu1 %v820_v6 }
 0x120   : > { %v905_v10 = vpop.permute.xlu1 %904  ;;  %v717_v11 = vsel %vm716_vm14, %v711_v0, %v713_v9 }
 0x121   : > { %v723_v15 = vsel %vm334_vm3, %v717_v11, 0 }
 0x122   : > { %1276 = vmatmul.mubr.msk.bf16.vlgmr.msra.gmra.mxu0 %vm330_vm5, %v1342_v7  ;;  %1291 = vmatmul.mubr.msk.bf16.vlgmr.msra.gmra.mxu1 %vm330_vm5, %v1344_v8 }
 0x123   : > { %v907_v12 = vpop.permute.xlu0 %906  ;;  %760 = vmatprep.mubr.bf16.mxu0 %v1368_v57  ;;  %1051 = vmatprep.mubr.bf16.mxu1 %v1368_v57 }
 0x124   : > { %v715_v13 = vpop.permute.xlu1 %714  ;;  %v911_v17 = vsel %vm910_vm15, %v905_v10, %v907_v12 }
 0x125   : > { %v718_v14 = vsel %vm716_vm14, %v713_v9, %v715_v13  ;;  %v917_v22 = vsel %vm334_vm3, %v911_v17, 0 }
 0x126   : > { %1285 = vmatprep.subr.msk.bf16.mxu0 %vm334_vm3, %v718_v14 }
 0x127   : > { %743 = vmatpush1.bf16.msra.mxu0 %v723_v15  ;;  %v1002_v18 = vpop.permute.xlu0 %1001 }
 0x128   : > { %v909_v19 = vpop.permute.xlu1 %908 }
 0x129   : > { %v912_v21 = vsel %vm910_vm15, %v907_v12, %v909_v19 }
 0x12a   : > { %1286 = vmatmul.mubr.msk.bf16.vlgmr.msra.gmra.mxu0 %vm330_vm5, %v1343_v16  ;;  %1295 = vmatprep.subr.msk.bf16.mxu0 %vm334_vm3, %v912_v21 }
 0x12b   : > { %937 = vmatpush1.bf16.msra.mxu0 %v917_v22  ;;  %v1006_v23 = vpop.permute.xlu0 %1005  ;;  %954 = vmatprep.mubr.bf16.mxu0 %v1368_v57 }
 0x12c   : > { %v1099_v24 = vpop.permute.xlu1 %1098 }
 0x12f   : > { %v1101_v26 = vpop.permute.xlu0 %1100 }
 0x130   : > { %v1004_v27 = vpop.permute.xlu1 %1003  ;;  %v1105_v32 = vsel %vm1104_vm1, %v1099_v24, %v1101_v26 }
 0x131   : > { %v1008_v28 = vsel %vm1007_vm0, %v1002_v18, %v1004_v27  ;;  %v1009_v29 = vsel %vm1007_vm0, %v1004_v27, %v1006_v23  ;;  %v1111_v36 = vsel %vm334_vm3, %v1105_v32, 0 }
 0x132   : > { %v1014_v30 = vsel %vm334_vm3, %v1008_v28, 0  ;;  %1296 = vmatmul.mubr.msk.bf16.vlgmr.msra.gmra.mxu0 %vm330_vm5, %v1345_v25  ;;  %1300 = vmatprep.subr.msk.bf16.mxu1 %vm334_vm3, %v1009_v29 }
 0x133   : > { %1034 = vmatpush1.bf16.msra.mxu1 %v1014_v30  ;;  %1148 = vmatprep.mubr.bf16.mxu0 %v1368_v57 }
 0x134   : > { %v1103_v34 = vpop.permute.xlu1 %1102 }
 0x135   : > { %v1106_v35 = vsel %vm1104_vm1, %v1101_v26, %v1103_v34 }
 0x136   : > { %1301 = vmatmul.mubr.msk.bf16.vlgmr.msra.gmra.mxu1 %vm330_vm5, %v1346_v31  ;;  %1305 = vmatprep.subr.msk.bf16.mxu0 %vm334_vm3, %v1106_v35 }
 0x137   : > { %1131 = vmatpush1.bf16.msra.mxu0 %v1111_v36 }
 0x13a   : > { %1306 = vmatmul.mubr.msk.bf16.vlgmr.msra.gmra.mxu0 %vm330_vm5, %v1347_v37 }
 0x13c   : > { %v1168_v26 = vpop.permute.xlu0 %1167 }
 0x141   : > { %v1173_v14 = vpop.permute.xlu1 %1172 }
 0x145   : > { %v1184_v34 = vpop.permute.xlu1 %1183 }
 0x1d9   : > { %v665_v57 = vpop.f32.mrf.mxu1 }
 0x1da   : > { %v375_v41 = vpop.f32.mrf.mxu0 }
 0x1db   : > { %v667_v43 = vpop.f32.mrf.mxu1  ;;  %v442_v52 = vadd.f32 %v441_v38, %v375_v41 }
 0x1dc   : > { %v377_v42 = vpop.f32.mrf.mxu0 }
 0x1dd   : > { %v669_v20 = vpop.f32.mrf.mxu1  ;;  %v444_v54 = vadd.f32 %v443_v39, %v377_v42 }
 0x1de   : > { %v379_v44 = vpop.f32.mrf.mxu0 }
 0x1df   : > { %v671_v48 = vpop.f32.mrf.mxu1  ;;  %v446_v59 = vadd.f32 %v445_v33, %v379_v44 }
 0x1e0   : > { %v381_v45 = vpop.f32.mrf.mxu0 }
 0x1e1   : > { %v448_v62 = vadd.f32 %v447_v40, %v381_v45 }
 0x1e2   : > { %v568_v46 = vpop.f32.mrf.mxu0  ;;  %v859_v51 = vpop.f32.mrf.mxu1 }
 0x1e3   : > { %v577_v55 = vadd.f32 %v568_v46, %v442_v52 }
 0x1e4   : > { %v570_v47 = vpop.f32.mrf.mxu0  ;;  %v861_v58 = vpop.f32.mrf.mxu1 }
 0x1e5   : > { %v578_v60 = vadd.f32 %v570_v47, %v444_v54  ;;  %v674_v63 = vadd.f32 %v665_v57, %v577_v55  ;;  %v1189_v47 = vpop.permute.xlu0 %1188 }
 0x1e6   : > { %v572_v49 = vpop.f32.mrf.mxu0  ;;  %v863_v2 = vpop.f32.mrf.mxu1 }
 0x1e7   : > { %v579_v0 = vadd.f32 %v572_v49, %v446_v59  ;;  %v675_v3 = vadd.f32 %v667_v43, %v578_v60 }
 0x1e8   : > { %v574_v50 = vpop.f32.mrf.mxu0  ;;  %v865_v9 = vpop.f32.mrf.mxu1 }
 0x1e9   : > { %v580_v4 = vadd.f32 %v574_v50, %v448_v62  ;;  %v676_v7 = vadd.f32 %v669_v20, %v579_v0 }
 0x1ea   : > { %v762_v53 = vpop.f32.mrf.mxu0 }
 0x1eb   : > { %v771_v5 = vadd.f32 %v762_v53, %v674_v63  ;;  %v677_v11 = vadd.f32 %v671_v48, %v580_v4 }
 0x1ec   : > { %v764_v56 = vpop.f32.mrf.mxu0 }
 0x1ed   : > { %v772_v8 = vadd.f32 %v764_v56, %v675_v3  ;;  %v868_v12 = vadd.f32 %v859_v51, %v771_v5 }
 0x1ee   : > { %v766_v61 = vpop.f32.mrf.mxu0 }
 0x1ef   : > { %v773_v13 = vadd.f32 %v766_v61, %v676_v7  ;;  %v869_v17 = vadd.f32 %v861_v58, %v772_v8 }
 0x1f0   : > { %v768_v1 = vpop.f32.mrf.mxu0 }
 0x1f1   : > { %v774_v18 = vadd.f32 %v768_v1, %v677_v11  ;;  %v870_v23 = vadd.f32 %v863_v2, %v773_v13 }
 0x1f2   : > { %v956_v6 = vpop.f32.mrf.mxu0 }
 0x1f3   : > { %v965_v19 = vadd.f32 %v956_v6, %v868_v12  ;;  %v871_v29 = vadd.f32 %v865_v9, %v774_v18 }
 0x1f4   : > { %v958_v10 = vpop.f32.mrf.mxu0 }
 0x1f5   : > { %v966_v24 = vadd.f32 %v958_v10, %v869_v17 }
 0x1f6   : > { %v960_v15 = vpop.f32.mrf.mxu0  ;;  %v1053_v16 = vpop.f32.mrf.mxu1 }
 0x1f7   : > { %v1062_v25 = vadd.f32 %v1053_v16, %v965_v19  ;;  %v967_v30 = vadd.f32 %v960_v15, %v870_v23 }
 0x1f8   : > { %v962_v21 = vpop.f32.mrf.mxu0  ;;  %v1055_v22 = vpop.f32.mrf.mxu1 }
 0x1f9   : > { %v1063_v31 = vadd.f32 %v1055_v22, %v966_v24  ;;  %v968_v37 = vadd.f32 %v962_v21, %v871_v29 }
 0x1fa   : > { %v1057_v27 = vpop.f32.mrf.mxu1  ;;  %v1150_v28 = vpop.f32.mrf.mxu0 }
 0x1fb   : > { %v1159_v32 = vadd.f32 %v1150_v28, %v1062_v25  ;;  %v1064_v38 = vadd.f32 %v1057_v27, %v967_v30 }
 0x1fc   : > { %v1152_v35 = vpop.f32.mrf.mxu0  ;;  %v1059_v36 = vpop.f32.mrf.mxu1 }
 0x1fd   : > { %v1160_v39 = vadd.f32 %v1152_v35, %v1063_v31  ;;  %v1175_v33 = vmul.f32 %v1168_v26, %v1159_v32  ;;  %v1065_v41 = vadd.f32 %v1059_v36, %v968_v37 }
 0x1fe   : > { %v1154_v40 = vpop.f32.mrf.mxu0 }
 0x1ff   : > { %v1176_v57 = vmul.f32 %v1168_v26, %v1160_v39  ;;  %v1191_v42 = vadd.f32 %v1184_v34, %v1175_v33  ;;  %v1161_v43 = vadd.f32 %v1154_v40, %v1064_v38 }
 0x200   : > { %v1156_v44 = vpop.f32.mrf.mxu0 }
 0x201   : > { %v1192_v45 = vadd.f32 %v1184_v34, %v1176_v57  ;;  %1195 = vst [vmem:[%s224_s27] sm:$0xff] %v1191_v42  ;;  %v1162_v20 = vadd.f32 %v1156_v44, %v1065_v41  ;;  %v1177_v46 = vmul.f32 %v1173_v14, %v1161_v43 }
 0x203   : > { %1196 = vst [vmem:[%s224_s27 + $0x8] sm:$0xff] %v1192_v45  ;;  %v1178_v48 = vmul.f32 %v1173_v14, %v1162_v20  ;;  %v1193_v49 = vadd.f32 %v1189_v47, %v1177_v46 }
 0x205   : > { %v1194_v50 = vadd.f32 %v1189_v47, %v1178_v48  ;;  %1197 = vst [vmem:[%s224_s27 + $0x10] sm:$0xff] %v1193_v49 }
 0x207   : > { %1198 = vst [vmem:[%s224_s27 + $0x18] sm:$0xff] %v1194_v50 }
 0x208 PF: > { %s15_s18 = sadd.s32 1, %s1354_s18  }
 0x209   : > { %p12_p4 = scmp.ge.s32.totalorder %s15_s18, 4  }
 0x20b   :  { %14 = sbr.rel (!%p12_p4) target bundleno = 1 (0x1), region = 78 }

// kernel: masked_conv2d_bn.2
= control target key start
LH: loop header
LB: loop body
LE: loop exit
PB: predicated region body
PF: predicated region fallthrough
CT: control target
= control target key end

     0   :  { %s1404_s15 = smov 0   ;;  %s1545_s0 = inlined_call_operand.vmem [shape: bf16[2,4,290], index: 0, kind: input, shape index: {}]   ;;  %s1546_s1 = inlined_call_operand.vmem [shape: bf16[9,16,4], index: 1, kind: input, shape index: {}]   ;;  %s1547_s2 = inlined_call_operand.vmem [shape: bf16[3,256], index: 2, kind: input, shape index: {}]   ;;  %s1548_s3 = inlined_call_operand.vmem [shape: f32[2,16,1], index: 3, kind: output, shape index: {0}]   ;;  %s1549_s4 = inlined_call_operand.vmem [shape: f32[2,16,1], index: 4, kind: output, shape index: {1}]  }
   0x1 LB: > { %s1258_s16 = sadd.s32 4294967295, %s1359_s15   ;;  %p1262_p0 = scmp.ge.s32.totalorder %s1359_s15, 1  ;;  %s1359_s15 = sphi %s1404_s15, %s15_s15  }
   0x2   : > { %p165_p1 = scmp.lt.s32.totalorder %s1359_s15, 3 }
   0x4   : > { %p166_p2 = pnand %p1262_p0, %p165_p1 }
   0x5   : > { %s1362_s21 = smov (!%p166_p2), 16   ;;  %s1363_s22 = smov (!%p166_p2), 1  }
   0x6   : > { %169 = sbr.rel (%p166_p2) target bundleno = 660 (0x294), region = 32  ;;  %s1364_s23 = smov (!%p166_p2), 17  }
   0x7   : > { %s1365_s24 = smov (!%p166_p2), 2   ;;  %s1366_s25 = smov (!%p166_p2), 32  }
   0x8   : > { %s1367_s26 = smov (!%p166_p2), 18   ;;  %s1368_s27 = smov (!%p166_p2), 34  }
   0x9   : > { %s1369_s28 = smov (!%p166_p2), 33   ;;  %p196_p3 = scmp.lt.s32.totalorder (!%p166_p2), %s1258_s16, 1 }
   0xa   : > { %s1370_s7 = smov (!%p166_p2), 112   ;;  %s1371_s8 = smov (!%p166_p2), 127  }
   0xb   : > { %v1268_v0 = vld.sshfl [vmem:[%s1547_s2] sm:$0x11 pattern:$0x76325410]  ;;  %v226_v1 = vlaneseq  ;;  %v1361_v3 = vmov 1983009808  }
   0xc   : > { %v222_v2 = vcombine.high %v1268_v0, %v1268_v0  ;;  %v241_v4 = vunpack.c.l.s4 %v1361_v3  ;;  %v251_v5 = vshrl.u32 %v1268_v0, 16  ;;  %v224_v6 = vpack.i.b16 %v1268_v0, %v1268_v0  ;;  %v1277_v8 = vld.sshfl [vmem:[%s1547_s2] sm:$0x22 pattern:$0x76325410]  ;;  %s1551_s16 = smov (!%p196_p3, %s1258_s16), 1 }
   0xd   : > { %v227_v7 = vshrl.u32 %v226_v1, 7  ;;  %v445_v14 = vcombine.high %v1277_v8, %v1277_v8  ;;  %v447_v15 = vpack.i.b16 %v1277_v8, %v1277_v8  ;;  %s1317_s29 = smul.u32 6, %s1551_s16  ;;  %vm570_vm0 = vcmask 130048   ;;  %s1372_s9 = smov 126   ;;  %v1344_v58 = vld [vmem:[%s1546_s1] sm:$0xff]  }
   0xe   : > { %v231_v9 = vpack.i.b16 %v222_v2, %v222_v2  ;;  %v242_v10 = vunpack.c.0.s8 %v241_v4  ;;  %v252_v11 = vpack.i.b16 %v251_v5, %v251_v5  ;;  %v258_v12 = vshrl.u32 %v222_v2, 16  ;;  %s1374_s12 = smov 110   ;;  %s1375_s13 = smov 111  }
   0xf   : > { %v228_v13 = vsub.s32 0, %v227_v7  ;;  %v451_v16 = vsub.s32 1, %v227_v7  ;;  %v454_v24 = vpack.i.b16 %v445_v14, %v445_v14  ;;  %s200_s6 = scalar_lea.vmem %s1545_s0, %s1317_s29  ;;  %vm278_vm1 = vcmask 7168   ;;  %s1376_s14 = smov 96  }
  0x10   : > { %v259_v17 = vpack.i.b16 %v258_v12, %v258_v12  ;;  %v1418_v20 = vsub.s32 %v242_v10, %v227_v7  ;;  %v1433_v33 = vld [vmem:[%s200_s6] sm:$0x3f]  ;;  %vm473_vm2 = vcmask 15360   ;;  %vm320_vm3 = vcmask 1041408   ;;  %s1377_s17 = smov 95   ;;  %s1378_s18 = smov 94  }
  0x11   : > { %v229_v18 = vrot.slane %v224_v6, %v228_v13  ;;  %v236_v19 = vrot.slane %v231_v9, %v228_v13  ;;  %v257_v21 = vrot.slane %v252_v11, %v228_v13  ;;  %v452_v23 = vrot.slane %v447_v15, %v451_v16 }
  0x12   : > { %v264_v22 = vrot.slane %v259_v17, %v228_v13  ;;  %v459_v27 = vrot.slane %v454_v24, %v451_v16  ;;  %v1373_v57 = vmov 0   ;;  %vm764_vm4 = vcmask 146432  }
  0x13   : > { %v239_v25 = vcombine.low %v229_v18, %v236_v19  ;;  %425 = vmatprep.mubr.bf16.mxu1 %v1373_v57  ;;  %359 = vmatprep.mubr.bf16.mxu0 %v1373_v57  ;;  %vm316_vm5 = vcmask 31744   ;;  %vm667_vm6 = vcmask 138240   ;;  %vm861_vm7 = vcmask 261120  }
  0x14   : > { %v267_v26 = vcombine.low %v257_v21, %v264_v22  ;;  %v462_v30 = vcombine.low %v452_v23, %v459_v27  ;;  %vm958_vm8 = vcmask 269312   ;;  %vm1055_vm9 = vcmask 277504  }
  0x15   : > { %v246_v28 = vrot.slane %v239_v25, %v1418_v20  ;;  %vm605_vm10 = vcmask 916480   ;;  %vm313_vm11 = vcmask 1039360   ;;  %vm508_vm12 = vcmask 1031168  }
  0x16   : > { %v274_v29 = vrot.slane %v267_v26, %v1418_v20  ;;  %v469_v31 = vrot.slane %v462_v30, %v1418_v20  ;;  %vm799_vm13 = vcmask 900096   ;;  %vm702_vm14 = vcmask 908288  }
  0x17   : > { %567 = vrot.lane.b32.xlu1 %v246_v28, %s1362_s21  ;;  %v248_v37 = vmul.bf16 %v246_v28, %v1433_v33  ;;  %vm896_vm15 = vcmask 785408  }
  0x18   : > { %275 = vrot.lane.b32.xlu0 %v274_v29, %s1363_s22 }
  0x19   : > { %v382_v41 = vrot.slane %v248_v37, %v1418_v20 }
  0x1b   : > { %664 = vrot.lane.b32.xlu1 %v274_v29, %s1364_s23  ;;  %v383_v46 = vcombine.high %v382_v41, %v382_v41  ;;  %v388_v51 = vsel %vm320_vm3, %v382_v41, 0 }
  0x1c   : > { %470 = vrot.lane.b32.xlu0 %v469_v31, %s1365_s24 }
  0x1d   : > { %1275 = vmatprep.subr.msk.bf16.mxu1 %vm320_vm3, %v383_v46 }
  0x1e   : > { %408 = vmatpush1.bf16.msra.mxu1 %v388_v51 }
  0x1f   : > { %858 = vrot.lane.b32.xlu1 %v246_v28, %s1366_s25 }
  0x20   : > { %761 = vrot.lane.b32.xlu0 %v469_v31, %s1367_s26 }
  0x21   : > { %1276 = vmatmul.mubr.msk.bf16.vlgmr.msra.gmra.mxu1 %vm316_vm5, %v1344_v58 }
  0x22   : > { %649 = vmatprep.mubr.bf16.mxu1 %v1373_v57 }
  0x23   : > { %1052 = vrot.lane.b32.xlu1 %v469_v31, %s1368_s27 }
  0x24   : > { %955 = vrot.lane.b32.xlu0 %v274_v29, %s1369_s28 }
  0x89   : > { %v568_v32 = vpop.permute.xlu1 %567 }
  0x8a   : > { %v569_v34 = vrot.slane %v568_v32, 6  ;;  %v276_v35 = vpop.permute.xlu0 %275 }
  0x8b   : > { %v277_v36 = vrot.slane %v276_v35, 6 }
  0x8c   : > { %v571_v38 = vsel %vm570_vm0, %v569_v34, %v568_v32  ;;  %vm993_vm0 = vcmask 777216  }
  0x8d   : > { %v573_v39 = vmul.bf16 %v571_v38, %v1433_v33  ;;  %v279_v40 = vsel %vm278_vm1, %v277_v36, %v276_v35  ;;  %v665_v55 = vpop.permute.xlu1 %664 }
  0x8e   : > { %v471_v42 = vpop.permute.xlu0 %470  ;;  %v281_v43 = vmul.bf16 %v279_v40, %v1433_v33  ;;  %v666_v61 = vrot.slane %v665_v55, 6 }
  0x8f   : > { %v472_v44 = vrot.slane %v471_v42, 6  ;;  %v590_v45 = vrot.slane %v573_v39, %v1418_v20  ;;  %v583_v63 = vcombine.high %v573_v39, %v573_v39 }
  0x90   : > { %v298_v49 = vrot.slane %v281_v43, %v1418_v20  ;;  %v291_v59 = vcombine.high %v281_v43, %v281_v43  ;;  %v668_v2 = vsel %vm667_vm6, %v666_v61, %v665_v55  ;;  %v1345_v55 = vld [vmem:[%s1546_s1 + $0x8] sm:$0xff]  }
  0x91   : > { %v474_v47 = vsel %vm473_vm2, %v472_v44, %v471_v42  ;;  %599 = vrot.lane.b32.xlu0 %v590_v45, %s1370_s7  ;;  %v598_v1 = vcombine.high %v590_v45, %v590_v45  ;;  %v859_v4 = vpop.permute.xlu1 %858  ;;  %v597_v5 = vrot.slane %v583_v63, %v1418_v20  ;;  %v670_v6 = vmul.bf16 %v668_v2, %v1433_v33 }
  0x92   : > { %v476_v48 = vmul.bf16 %v474_v47, %v1433_v33  ;;  %v762_v50 = vpop.permute.xlu0 %761  ;;  %v305_v0 = vrot.slane %v291_v59, %v1418_v20  ;;  %v306_v7 = vcombine.high %v298_v49, %v298_v49  ;;  %v860_v8 = vrot.slane %v859_v4, 6 }
  0x93   : > { %v763_v56 = vrot.slane %v762_v50, 6  ;;  %v687_v13 = vrot.slane %v670_v6, %v1418_v20  ;;  %v680_v23 = vcombine.high %v670_v6, %v670_v6  ;;  %vm1090_vm2 = vcmask 769024  }
  0x94   : > { %v486_v52 = vcombine.high %v476_v48, %v476_v48  ;;  %v493_v53 = vrot.slane %v476_v48, %v1418_v20  ;;  %v862_v12 = vsel %vm861_vm7, %v860_v8, %v859_v4  ;;  %v1349_v4 = vld [vmem:[%s1546_s1 + $0x28] sm:$0xff]  }
  0x95   : > { %307 = vrot.lane.b32.xlu0 %v298_v49, %s1371_s8  ;;  %v765_v62 = vsel %vm764_vm4, %v763_v56, %v762_v50  ;;  %v864_v16 = vmul.bf16 %v862_v12, %v1433_v33  ;;  %v1053_v18 = vpop.permute.xlu1 %1052  ;;  %v695_v21 = vcombine.high %v687_v13, %v687_v13  ;;  %v694_v29 = vrot.slane %v680_v23, %v1418_v20  ;;  %v1348_v12 = vld [vmem:[%s1546_s1 + $0x20] sm:$0xff]  }
  0x96   : > { %502 = vrot.lane.b32.xlu1 %v493_v53, %s1372_s9  ;;  %v501_v54 = vcombine.high %v493_v53, %v493_v53  ;;  %v500_v60 = vrot.slane %v486_v52, %v1418_v20  ;;  %v767_v3 = vmul.bf16 %v765_v62, %v1433_v33  ;;  %v956_v11 = vpop.permute.xlu0 %955  ;;  %v1054_v24 = vrot.slane %v1053_v18, 6  ;;  %v1346_v53 = vld [vmem:[%s1546_s1 + $0x18] sm:$0xff]  }
  0x97   : > { %v957_v15 = vrot.slane %v956_v11, 6  ;;  %v881_v22 = vrot.slane %v864_v16, %v1418_v20  ;;  %v874_v27 = vcombine.high %v864_v16, %v864_v16 }
  0x98   : > { %v777_v9 = vcombine.high %v767_v3, %v767_v3  ;;  %v784_v10 = vrot.slane %v767_v3, %v1418_v20  ;;  %v1056_v28 = vsel %vm1055_vm9, %v1054_v24, %v1053_v18  ;;  %v1347_v3 = vld [vmem:[%s1546_s1 + $0x10] sm:$0xff]  }
  0x99   : > { %504 = vrot.lane.b32.xlu0 %v501_v54, %s1372_s9  ;;  %v959_v19 = vsel %vm958_vm8, %v957_v15, %v956_v11  ;;  %v889_v26 = vcombine.high %v881_v22, %v881_v22  ;;  %v1058_v32 = vmul.bf16 %v1056_v28, %v1433_v33  ;;  %v888_v34 = vrot.slane %v874_v27, %v1418_v20  ;;  %v1351_v27 = vld [vmem:[%s1546_s1 + $0x38] sm:$0xff]  }
  0x9a   : > { %506 = vrot.lane.b32.xlu1 %v500_v60, %s1372_s9  ;;  %v791_v14 = vrot.slane %v777_v9, %v1418_v20  ;;  %v792_v17 = vcombine.high %v784_v10, %v784_v10  ;;  %v961_v25 = vmul.bf16 %v959_v19, %v1433_v33  ;;  %s1315_s9 = sshll.u32 %s1551_s16, 4 }
  0x9b   : > { %v1075_v36 = vrot.slane %v1058_v32, %v1418_v20  ;;  %v1068_v38 = vcombine.high %v1058_v32, %v1058_v32  ;;  %v1352_v32 = vld [vmem:[%s1546_s1 + $0x40] sm:$0xff]  }
  0x9c   : > { %v971_v30 = vcombine.high %v961_v25, %v961_v25  ;;  %v978_v31 = vrot.slane %v961_v25, %v1418_v20 }
  0x9d   : > { %311 = vrot.lane.b32.xlu0 %v305_v0, %s1371_s8  ;;  %v1083_v37 = vcombine.high %v1075_v36, %v1075_v36  ;;  %v1082_v40 = vrot.slane %v1068_v38, %v1418_v20 }
  0x9e   : > { %601 = vrot.lane.b32.xlu1 %v598_v1, %s1370_s7  ;;  %v985_v35 = vrot.slane %v971_v30, %v1418_v20  ;;  %v986_v39 = vcombine.high %v978_v31, %v978_v31 }
  0xa1   : > { %603 = vrot.lane.b32.xlu0 %v597_v5, %s1370_s7 }
  0xa2   : > { %309 = vrot.lane.b32.xlu1 %v306_v7, %s1371_s8 }
  0xa5   : > { %793 = vrot.lane.b32.xlu0 %v784_v10, %s1374_s12 }
  0xa6   : > { %696 = vrot.lane.b32.xlu1 %v687_v13, %s1375_s13 }
  0xa9   : > { %797 = vrot.lane.b32.xlu0 %v791_v14, %s1374_s12 }
  0xaa   : > { %795 = vrot.lane.b32.xlu1 %v792_v17, %s1374_s12  ;;  %s205_s12 = scalar_lea.vmem %s1548_s3, %s1315_s9 }
  0xad   : > { %698 = vrot.lane.b32.xlu0 %v695_v21, %s1375_s13  ;;  %v1350_v21 = vld [vmem:[%s1546_s1 + $0x30] sm:$0xff]  }
  0xae   : > { %890 = vrot.lane.b32.xlu1 %v881_v22, %s1376_s14 }
  0xb1   : > { %892 = vrot.lane.b32.xlu0 %v889_v26, %s1376_s14 }
  0xb2   : > { %700 = vrot.lane.b32.xlu1 %v694_v29, %s1375_s13 }
  0xb5   : > { %987 = vrot.lane.b32.xlu0 %v978_v31, %s1377_s17 }
  0xb6   : > { %894 = vrot.lane.b32.xlu1 %v888_v34, %s1376_s14 }
  0xb9   : > { %991 = vrot.lane.b32.xlu0 %v985_v35, %s1377_s17 }
  0xba   : > { %1084 = vrot.lane.b32.xlu1 %v1075_v36, %s1378_s18 }
  0xbd   : > { %1086 = vrot.lane.b32.xlu0 %v1083_v37, %s1378_s18 }
  0xbe   : > { %989 = vrot.lane.b32.xlu1 %v986_v39, %s1377_s17  ;;  %s210_s17 = scalar_lea.vmem %s1549_s4, %s1315_s9 }
  0xc2   : > { %1088 = vrot.lane.b32.xlu1 %v1082_v40, %s1378_s18 }
  0xe1   : > { %v427_v34 = vpop.f32.mrf.mxu1 }
  0xe3   : > { %v429_v35 = vpop.f32.mrf.mxu1 }
  0xe5   : > { %v431_v36 = vpop.f32.mrf.mxu1 }
  0xe7   : > { %v433_v37 = vpop.f32.mrf.mxu1 }
 0x103   : > { %v600_v33 = vpop.permute.xlu0 %599 }
 0x107   : > { %v308_v41 = vpop.permute.xlu0 %307 }
 0x108   : > { %v503_v42 = vpop.permute.xlu1 %502 }
 0x10b   : > { %v505_v43 = vpop.permute.xlu0 %504 }
 0x10c   : > { %v507_v44 = vpop.permute.xlu1 %506  ;;  %v509_v56 = vsel %vm508_vm12, %v503_v42, %v505_v43 }
 0x10d   : > { %v510_v58 = vsel %vm508_vm12, %v505_v43, %v507_v44  ;;  %v515_v61 = vsel %vm320_vm3, %v509_v56, 0 }
 0x10f   : > { %v312_v45 = vpop.permute.xlu0 %311 }
 0x110   : > { %v602_v46 = vpop.permute.xlu1 %601 }
 0x111   : > { %v606_v47 = vsel %vm605_vm10, %v600_v33, %v602_v46 }
 0x112   : > { %v612_v51 = vsel %vm320_vm3, %v606_v47, 0 }
 0x113   : > { %v604_v48 = vpop.permute.xlu0 %603 }
 0x114   : > { %v607_v49 = vsel %vm605_vm10, %v602_v46, %v604_v48  ;;  %v310_v50 = vpop.permute.xlu1 %309 }
 0x115   : > { %1286 = vmatprep.subr.msk.bf16.mxu1 %vm320_vm3, %v607_v49  ;;  %v315_v20 = vsel %vm313_vm11, %v310_v50, %v312_v45  ;;  %v314_v52 = vsel %vm313_vm11, %v308_v41, %v310_v50 }
 0x116   : > { %1272 = vmatprep.subr.msk.bf16.mxu0 %vm320_vm3, %v315_v20  ;;  %632 = vmatpush1.bf16.msra.mxu1 %v612_v51  ;;  %v322_v54 = vsel %vm320_vm3, %v314_v52, 0 }
 0x117   : > { %342 = vmatpush1.bf16.msra.mxu0 %v322_v54  ;;  %v794_v59 = vpop.permute.xlu0 %793 }
 0x118   : > { %v697_v60 = vpop.permute.xlu1 %696  ;;  %1281 = vmatprep.subr.msk.bf16.mxu0 %vm320_vm3, %v510_v58 }
 0x119   : > { %1287 = vmatmul.mubr.msk.bf16.vlgmr.msra.gmra.mxu1 %vm316_vm5, %v1346_v53 }
 0x11a   : > { %1273 = vmatmul.mubr.msk.bf16.vlgmr.msra.gmra.mxu0 %vm316_vm5, %v1345_v55  ;;  %843 = vmatprep.mubr.bf16.mxu1 %v1373_v57 }
 0x11b   : > { %535 = vmatpush1.bf16.msra.mxu0 %v515_v61  ;;  %v798_v62 = vpop.permute.xlu0 %797  ;;  %552 = vmatprep.mubr.bf16.mxu0 %v1373_v57 }
 0x11c   : > { %v796_v63 = vpop.permute.xlu1 %795 }
 0x11d   : > { %v800_v0 = vsel %vm799_vm13, %v794_v59, %v796_v63  ;;  %v801_v1 = vsel %vm799_vm13, %v796_v63, %v798_v62 }
 0x11e   : > { %v806_v2 = vsel %vm320_vm3, %v800_v0, 0  ;;  %1296 = vmatprep.subr.msk.bf16.mxu1 %vm320_vm3, %v801_v1 }
 0x11f   : > { %v699_v5 = vpop.permute.xlu0 %698  ;;  %826 = vmatpush1.bf16.msra.mxu1 %v806_v2 }
 0x120   : > { %v891_v6 = vpop.permute.xlu1 %890  ;;  %v703_v7 = vsel %vm702_vm14, %v697_v60, %v699_v5 }
 0x121   : > { %v709_v11 = vsel %vm320_vm3, %v703_v7, 0 }
 0x122   : > { %1282 = vmatmul.mubr.msk.bf16.vlgmr.msra.gmra.mxu0 %vm316_vm5, %v1347_v3  ;;  %1297 = vmatmul.mubr.msk.bf16.vlgmr.msra.gmra.mxu1 %vm316_vm5, %v1349_v4 }
 0x123   : > { %v893_v8 = vpop.permute.xlu0 %892  ;;  %746 = vmatprep.mubr.bf16.mxu0 %v1373_v57  ;;  %1037 = vmatprep.mubr.bf16.mxu1 %v1373_v57 }
 0x124   : > { %v701_v9 = vpop.permute.xlu1 %700  ;;  %v897_v13 = vsel %vm896_vm15, %v891_v6, %v893_v8 }
 0x125   : > { %v704_v10 = vsel %vm702_vm14, %v699_v5, %v701_v9  ;;  %v903_v17 = vsel %vm320_vm3, %v897_v13, 0 }
 0x126   : > { %1291 = vmatprep.subr.msk.bf16.mxu0 %vm320_vm3, %v704_v10 }
 0x127   : > { %729 = vmatpush1.bf16.msra.mxu0 %v709_v11  ;;  %v988_v14 = vpop.permute.xlu0 %987 }
 0x128   : > { %v895_v15 = vpop.permute.xlu1 %894 }
 0x129   : > { %v898_v16 = vsel %vm896_vm15, %v893_v8, %v895_v15 }
 0x12a   : > { %1292 = vmatmul.mubr.msk.bf16.vlgmr.msra.gmra.mxu0 %vm316_vm5, %v1348_v12  ;;  %1301 = vmatprep.subr.msk.bf16.mxu0 %vm320_vm3, %v898_v16 }
 0x12b   : > { %923 = vmatpush1.bf16.msra.mxu0 %v903_v17  ;;  %v992_v18 = vpop.permute.xlu0 %991  ;;  %940 = vmatprep.mubr.bf16.mxu0 %v1373_v57 }
 0x12c   : > { %v1085_v19 = vpop.permute.xlu1 %1084 }
 0x12f   : > { %v1087_v22 = vpop.permute.xlu0 %1086 }
 0x130   : > { %v990_v23 = vpop.permute.xlu1 %989  ;;  %v1091_v28 = vsel %vm1090_vm2, %v1085_v19, %v1087_v22 }
 0x131   : > { %v994_v24 = vsel %vm993_vm0, %v988_v14, %v990_v23  ;;  %v995_v25 = vsel %vm993_vm0, %v990_v23, %v992_v18  ;;  %v1097_v31 = vsel %vm320_vm3, %v1091_v28, 0 }
 0x132   : > { %v1000_v26 = vsel %vm320_vm3, %v994_v24, 0  ;;  %1302 = vmatmul.mubr.msk.bf16.vlgmr.msra.gmra.mxu0 %vm316_vm5, %v1350_v21  ;;  %1306 = vmatprep.subr.msk.bf16.mxu1 %vm320_vm3, %v995_v25 }
 0x133   : > { %1020 = vmatpush1.bf16.msra.mxu1 %v1000_v26  ;;  %1134 = vmatprep.mubr.bf16.mxu0 %v1373_v57 }
 0x134   : > { %v1089_v29 = vpop.permute.xlu1 %1088 }
 0x135   : > { %v1092_v30 = vsel %vm1090_vm2, %v1087_v22, %v1089_v29 }
 0x136   : > { %1307 = vmatmul.mubr.msk.bf16.vlgmr.msra.gmra.mxu1 %vm316_vm5, %v1351_v27  ;;  %1311 = vmatprep.subr.msk.bf16.mxu0 %vm320_vm3, %v1092_v30 }
 0x137   : > { %1117 = vmatpush1.bf16.msra.mxu0 %v1097_v31 }
 0x13a   : > { %1312 = vmatmul.mubr.msk.bf16.vlgmr.msra.gmra.mxu0 %vm316_vm5, %v1352_v32 }
 0x1d9   : > { %v651_v57 = vpop.f32.mrf.mxu1 }
 0x1da   : > { %v361_v38 = vpop.f32.mrf.mxu0 }
 0x1db   : > { %v653_v40 = vpop.f32.mrf.mxu1  ;;  %v428_v50 = vadd.f32 %v427_v34, %v361_v38 }
 0x1dc   : > { %v363_v39 = vpop.f32.mrf.mxu0 }
 0x1dd   : > { %v655_v42 = vpop.f32.mrf.mxu1  ;;  %v430_v51 = vadd.f32 %v429_v35, %v363_v39 }
 0x1de   : > { %v365_v33 = vpop.f32.mrf.mxu0 }
 0x1df   : > { %v657_v45 = vpop.f32.mrf.mxu1  ;;  %v432_v56 = vadd.f32 %v431_v36, %v365_v33 }
 0x1e0   : > { %v367_v41 = vpop.f32.mrf.mxu0 }
 0x1e1   : > { %v434_v58 = vadd.f32 %v433_v37, %v367_v41 }
 0x1e2   : > { %v554_v43 = vpop.f32.mrf.mxu0  ;;  %v845_v48 = vpop.f32.mrf.mxu1 }
 0x1e3   : > { %v563_v53 = vadd.f32 %v554_v43, %v428_v50 }
 0x1e4   : > { %v556_v44 = vpop.f32.mrf.mxu0  ;;  %v847_v52 = vpop.f32.mrf.mxu1 }
 0x1e5   : > { %v564_v54 = vadd.f32 %v556_v44, %v430_v51  ;;  %v660_v61 = vadd.f32 %v651_v57, %v563_v53 }
 0x1e6   : > { %v558_v46 = vpop.f32.mrf.mxu0  ;;  %v849_v60 = vpop.f32.mrf.mxu1 }
 0x1e7   : > { %v565_v62 = vadd.f32 %v558_v46, %v432_v56  ;;  %v661_v63 = vadd.f32 %v653_v40, %v564_v54 }
 0x1e8   : > { %v560_v47 = vpop.f32.mrf.mxu0  ;;  %v851_v4 = vpop.f32.mrf.mxu1 }
 0x1e9   : > { %v566_v0 = vadd.f32 %v560_v47, %v434_v58  ;;  %v662_v6 = vadd.f32 %v655_v42, %v565_v62 }
 0x1ea   : > { %v748_v49 = vpop.f32.mrf.mxu0 }
 0x1eb   : > { %v757_v2 = vadd.f32 %v748_v49, %v660_v61  ;;  %v663_v7 = vadd.f32 %v657_v45, %v566_v0 }
 0x1ec   : > { %v750_v20 = vpop.f32.mrf.mxu0 }
 0x1ed   : > { %v758_v3 = vadd.f32 %v750_v20, %v661_v63  ;;  %v854_v10 = vadd.f32 %v845_v48, %v757_v2 }
 0x1ee   : > { %v752_v55 = vpop.f32.mrf.mxu0 }
 0x1ef   : > { %v759_v11 = vadd.f32 %v752_v55, %v662_v6  ;;  %v855_v12 = vadd.f32 %v847_v52, %v758_v3 }
 0x1f0   : > { %v754_v59 = vpop.f32.mrf.mxu0 }
 0x1f1   : > { %v760_v13 = vadd.f32 %v754_v59, %v663_v7  ;;  %v856_v21 = vadd.f32 %v849_v60, %v759_v11 }
 0x1f2   : > { %v942_v1 = vpop.f32.mrf.mxu0 }
 0x1f3   : > { %v951_v16 = vadd.f32 %v942_v1, %v854_v10  ;;  %v857_v22 = vadd.f32 %v851_v4, %v760_v13 }
 0x1f4   : > { %v944_v5 = vpop.f32.mrf.mxu0 }
 0x1f5   : > { %v952_v17 = vadd.f32 %v944_v5, %v855_v12 }
 0x1f6   : > { %v946_v8 = vpop.f32.mrf.mxu0  ;;  %v1039_v9 = vpop.f32.mrf.mxu1 }
 0x1f7   : > { %v1048_v23 = vadd.f32 %v1039_v9, %v951_v16  ;;  %v953_v27 = vadd.f32 %v946_v8, %v856_v21 }
 0x1f8   : > { %v948_v14 = vpop.f32.mrf.mxu0  ;;  %v1041_v15 = vpop.f32.mrf.mxu1 }
 0x1f9   : > { %v1049_v24 = vadd.f32 %v1041_v15, %v952_v17  ;;  %v954_v28 = vadd.f32 %v948_v14, %v857_v22 }
 0x1fa   : > { %v1043_v18 = vpop.f32.mrf.mxu1  ;;  %v1136_v19 = vpop.f32.mrf.mxu0 }
 0x1fb   : > { %v1145_v29 = vadd.f32 %v1136_v19, %v1048_v23  ;;  %v1050_v32 = vadd.f32 %v1043_v18, %v953_v27 }
 0x1fc   : > { %v1045_v25 = vpop.f32.mrf.mxu1  ;;  %v1138_v26 = vpop.f32.mrf.mxu0 }
 0x1fd   : > { %v1146_v30 = vadd.f32 %v1138_v26, %v1049_v24  ;;  %v1051_v34 = vadd.f32 %v1045_v25, %v954_v28  ;;  %v1158_v57 = vmul.f32 %v1145_v29, %v1145_v29 }
 0x1fe   : > { %v1140_v31 = vpop.f32.mrf.mxu0 }
 0x1ff   : > { %v1159_v35 = vmul.f32 %v1146_v30, %v1146_v30  ;;  %v1149_v36 = vadd.f32 %v1146_v30, %v1145_v29  ;;  %v1147_v38 = vadd.f32 %v1140_v31, %v1050_v32 }
 0x200   : > { %v1142_v37 = vpop.f32.mrf.mxu0 }
 0x201   : > { %v1148_v39 = vadd.f32 %v1142_v37, %v1051_v34  ;;  %1150 = vadd.xlane.f32.xlu0 %v1149_v36  ;;  %v1162_v41 = vadd.f32 %v1159_v35, %v1158_v57  ;;  %v1160_v42 = vmul.f32 %v1147_v38, %v1147_v38 }
 0x203   : > { %v1161_v40 = vmul.f32 %v1148_v39, %v1148_v39  ;;  %v1152_v33 = vadd.f32 %v1148_v39, %v1147_v38 }
 0x205   : > { %1153 = vadd.xlane.f32.xlu1 %v1152_v33  ;;  %1163 = vadd.xlane.f32.xlu0 %v1162_v41  ;;  %v1165_v43 = vadd.f32 %v1161_v40, %v1160_v42 }
 0x209   : > { %1166 = vadd.xlane.f32.xlu0 %v1165_v43 }
 0x28a   : > { %v1151_v44 = vpop.xlane.xlu0 %1150 }
 0x28b   : > { %1156 = vst.msk [vmem:[%s205_s12] sm:$0xff] %vm278_vm1, %v1151_v44 }
 0x28e   : > { %v1154_v45 = vpop.xlane.xlu1 %1153  ;;  %v1164_v46 = vpop.xlane.xlu0 %1163 }
 0x28f   : > { %1157 = vst.msk [vmem:[%s205_s12 + $0x8] sm:$0xff] %vm278_vm1, %v1154_v45  ;;  %1168 = vst.msk [vmem:[%s210_s17] sm:$0xff] %vm278_vm1, %v1164_v46 }
 0x292   : > { %v1167_v47 = vpop.xlane.xlu0 %1166 }
 0x293   : > { %1169 = vst.msk [vmem:[%s210_s17 + $0x8] sm:$0xff] %vm278_vm1, %v1167_v47 }
 0x294 PF: > { %s15_s15 = sadd.s32 1, %s1359_s15  }
 0x295   : > { %p12_p4 = scmp.ge.s32.totalorder %s15_s15, 4  }
 0x297   :  { %14 = sbr.rel (!%p12_p4) target bundleno = 1 (0x1), region = 82 }

</bundles_post_ra>
